<compile_context>
chip_gen: v5e
topology: v5e:2x2
jax: 0.10.0
libtpu: 0.0.40
codegen_flags: <defaults>
</compile_context>

<pallas_src>
import functools

import jax
import jax.numpy as jnp
from jax import lax
from jax.experimental import pallas as pl
from jax.experimental.pallas import tpu as pltpu


def autopad(k, p=None, d=1):
    if d > 1:
        k = d * (k - 1) + 1 if isinstance(k, int) else [d * (x - 1) + 1 for x in k]
    if p is None:
        p = k // 2 if isinstance(k, int) else [x // 2 for x in k]
    return p


def _round_up(x, m):
    return (x + m - 1) // m * m


def _pick_tile_h(h_out, w_out, target_m=128):
    """Largest divisor of h_out keeping TILE_H * W_out around target_m matmul rows."""
    best = 1
    for t in range(1, h_out + 1):
        if h_out % t == 0 and t * w_out <= max(target_m, w_out):
            best = t
    return best


def conv_bn_relu_kernel(xp_ref, w_ref, bias_ref, out_ref, col_ref, *, K):
    """Fused conv + folded-BN bias + ReLU for one (batch, row-tile) grid point.

    xp_ref  : (Hp, Wp, C1p)        padded activations for this batch (bf16, VMEM)
    w_ref   : (K*K*C1p, C2p)       BN-scale-folded weights, taps stacked (bf16)
    bias_ref: (1, C2p)             folded BN bias (f32)
    out_ref : (TILE_H, W_out, C2p) output row tile (f32)
    col_ref : (TILE_H*W_out, K*K*C1p) VMEM scratch for the im2col slab (bf16)
    """
    C1p = xp_ref.shape[-1]
    TILE_H, W_out, C2p = out_ref.shape
    TILE_M = TILE_H * W_out

    # First row of this output tile inside the padded input (stride 1).
    h0 = pl.multiple_of(pl.program_id(1) * TILE_H, TILE_H)

    # --- im2col: build one lane-dense (TILE_M, K*K*C1p) slab in VMEM scratch. ---
    # Each tap slice is (TILE_H, W_out, C1p) with a 128-lane channel axis, so the
    # reshape/stores below are lane-aligned (no masked vst, no tiny-channel relayout).
    for kh in range(K):
        for kw in range(K):
            tap = kh * K + kw
            patch = xp_ref[pl.ds(h0 + kh, TILE_H), pl.ds(kw, W_out), :]
            col_ref[:, tap * C1p:(tap + 1) * C1p] = patch.reshape(TILE_M, C1p)

    # --- single MXU contraction over the full K*K*C1p depth, f32 accumulation. ---
    acc = jnp.dot(col_ref[...], w_ref[...], preferred_element_type=jnp.float32)

    # --- epilogue: folded-BN bias + ReLU; lane-dense (C2p = 128k) stores. ---
    y = jnp.maximum(acc + bias_ref[...], 0.0)
    out_ref[...] = y.reshape(TILE_H, W_out, C2p).astype(out_ref.dtype)


@functools.partial(jax.jit, static_argnames=("stride", "pad"))
def conv_module_forward(x_nchw, w_oihw, gamma, beta, run_mean, run_var,
                        stride=1, pad=1, eps=1e-5):
    """Equivalent of Conv.forward(x) (Conv2d no-bias -> BatchNorm2d eval -> ReLU)."""
    # TODO(synk): stride > 1 / groups > 1 / dilation > 1 variants of the generic
    # module are not implemented in this specialized stride-1 kernel.
    assert stride == 1, "this kernel is specialized for stride 1"

    N, C1, H, W = x_nchw.shape
    C2, _, K, _ = w_oihw.shape

    Hp, Wp = H + 2 * pad, W + 2 * pad
    H_out, W_out = Hp - K + 1, Wp - K + 1

    # Lane-dense channel padding.
    C1p = _round_up(C1, 128)
    C2p = _round_up(C2, 128)

    TILE_H = _pick_tile_h(H_out, W_out)          # divisor of H_out, ~128 matmul rows
    TILE_M = TILE_H * W_out
    n_h_tiles = H_out // TILE_H

    # ---- wrapper glue (plain JAX): BN folding, layout, padding, bf16 cast ----
    scale = gamma / jnp.sqrt(run_var + eps)                              # (C2,)
    bias = beta - run_mean * scale                                       # (C2,)

    # OIHW -> (K, K, C1, C2); fold BN scale into the weights; pad channels; stack taps.
    w_kkio = jnp.transpose(w_oihw, (2, 3, 1, 0)) * scale[None, None, None, :]
    w_kkio = jnp.pad(w_kkio, ((0, 0), (0, 0), (0, C1p - C1), (0, C2p - C2)))
    w_mat = w_kkio.reshape(K * K * C1p, C2p).astype(jnp.bfloat16)

    bias2d = jnp.pad(bias, (0, C2p - C2)).reshape(1, C2p).astype(jnp.float32)

    # NCHW -> NHWC, bf16, spatial zero-pad + channel zero-pad in one op.
    x_nhwc = jnp.transpose(x_nchw, (0, 2, 3, 1)).astype(jnp.bfloat16)
    xp = jnp.pad(x_nhwc, ((0, 0), (pad, pad), (pad, pad), (0, C1p - C1)))

    out_nhwc = pl.pallas_call(
        functools.partial(conv_bn_relu_kernel, K=K),
        out_shape=jax.ShapeDtypeStruct((N, H_out, W_out, C2p), jnp.float32),
        grid_spec=pltpu.PrefetchScalarGridSpec(
            num_scalar_prefetch=0,
            grid=(N, n_h_tiles),
            in_specs=[
                # Full padded image of one batch; block index constant across the
                # row-tile axis -> DMA'd once per batch, halo sliced in-kernel.
                pl.BlockSpec((None, Hp, Wp, C1p), lambda n, h: (n, 0, 0, 0)),
                # Weights / bias: single block, fetched once.
                pl.BlockSpec((K * K * C1p, C2p), lambda n, h: (0, 0)),
                pl.BlockSpec((1, C2p), lambda n, h: (0, 0)),
            ],
            out_specs=pl.BlockSpec((None, TILE_H, W_out, C2p),
                                   lambda n, h: (n, h, 0, 0)),
            scratch_shapes=[pltpu.VMEM((TILE_M, K * K * C1p), jnp.bfloat16)],
        ),
        compiler_params=pltpu.CompilerParams(
            dimension_semantics=("parallel", "parallel"),
        ),
    )(xp, w_mat, bias2d)

    out = out_nhwc[..., :C2]                         # drop channel padding
    return jnp.transpose(out, (0, 3, 1, 2))          # NHWC -> NCHW


def reference_forward(x_nchw, w_oihw, gamma, beta, run_mean, run_var,
                      stride=1, pad=1, eps=1e-5, operand_dtype=jnp.float32):
    """Pure-JAX reference; operand_dtype=bfloat16 mimics the kernel's operand cast."""
    scale = gamma / jnp.sqrt(run_var + eps)
    bias = beta - run_mean * scale
    w_folded = w_oihw * scale[:, None, None, None]
    xq = x_nchw.astype(operand_dtype).astype(jnp.float32)
    wq = w_folded.astype(operand_dtype).astype(jnp.float32)
    y = lax.conv_general_dilated(
        xq, wq, window_strides=(stride, stride),
        padding=((pad, pad), (pad, pad)),
        dimension_numbers=("NCHW", "OIHW", "NCHW"),
        precision=lax.Precision.HIGHEST)
    y = y + bias[None, :, None, None]
    return jnp.maximum(y, 0.0)


if __name__ == "__main__":
    # Conv(c1=4, c2=8, k=3, s=1) -> conv weight (8, 4, 3, 3), BN over 8 channels.
    N, C1, H, W = 2, 4, 16, 16
    C2, K, S = 8, 3, 1
    P = autopad(K)  # = 1

    key = jax.random.PRNGKey(0)
    kx, kw, kg, kb, km, kv = jax.random.split(key, 6)

    x = jax.random.normal(kx, (N, C1, H, W), dtype=jnp.float32)
    w = jax.random.normal(kw, (C2, C1, K, K), dtype=jnp.float32) * 0.1
    gamma = 1.0 + 0.1 * jax.random.normal(kg, (C2,), dtype=jnp.float32)
    beta = 0.1 * jax.random.normal(kb, (C2,), dtype=jnp.float32)
    run_mean = 0.05 * jax.random.normal(km, (C2,), dtype=jnp.float32)
    run_var = 1.0 + 0.1 * jnp.abs(jax.random.normal(kv, (C2,), dtype=jnp.float32))

    out = conv_module_forward(x, w, gamma, beta, run_mean, run_var, stride=S, pad=P)
    out = jax.block_until_ready(out)
    assert out.shape == (N, C2, H, W)

    # Tight check against a reference using the same bf16 operand rounding.
    ref_bf16 = reference_forward(x, w, gamma, beta, run_mean, run_var,
                                 stride=S, pad=P, operand_dtype=jnp.bfloat16)
    assert jnp.allclose(out, ref_bf16, atol=1e-3, rtol=1e-3)

    # Loose check against the pure-f32 module semantics (bf16 operand quant error).
    ref_f32 = reference_forward(x, w, gamma, beta, run_mean, run_var,
                                stride=S, pad=P, operand_dtype=jnp.float32)
    assert jnp.allclose(out, ref_f32, atol=5e-2, rtol=5e-2)

    print("KERNEL_OK")
</pallas_src>

<mosaic_0001>
module attributes {stable_mosaic.version = 11 : i64} {
  func.func @conv_bn_relu_kernel(%arg0: i32, %arg1: i32, %arg2: memref<1x18x18x128xbf16, #tpu.memory_space<vmem>>, %arg3: memref<1152x128xbf16, #tpu.memory_space<vmem>>, %arg4: memref<1x128xf32, #tpu.memory_space<vmem>>, %arg5: memref<1x8x16x128xf32, #tpu.memory_space<vmem>>, %arg6: memref<128x1152xbf16, #tpu.memory_space<vmem>>) attributes {dimension_semantics = [#tpu.dimension_semantics<parallel>, #tpu.dimension_semantics<parallel>], iteration_bounds = array<i64: 2, 2>, scalar_prefetch = 0 : i64, scratch_operands = 1 : i64, tpu.core_type = #tpu.core_type<tc>, window_params = [{transform_indices = @transform_0, window_bounds = array<i64: 1, 18, 18, 128>}, {pipeline_mode = #tpu.pipeline_mode<synchronous>, transform_indices = @transform_1, window_bounds = array<i64: 1152, 128>}, {pipeline_mode = #tpu.pipeline_mode<synchronous>, transform_indices = @transform_2, window_bounds = array<i64: 1, 128>}, {transform_indices = @transform_3, window_bounds = array<i64: 1, 8, 16, 128>}]} {
    %c8_i32 = arith.constant 8 : i32
    %0 = arith.muli %arg1, %c8_i32 : i32
    %1 = tpu.assume_multiple %0, 8 : i32
    %c0_i32 = arith.constant 0 : i32
    %2 = arith.addi %1, %c0_i32 : i32
    %c0 = arith.constant 0 : index
    %3 = arith.index_cast %2 : i32 to index
    %c0_0 = arith.constant 0 : index
    %c0_1 = arith.constant 0 : index
    %4 = vector.load %arg2[%c0, %3, %c0_0, %c0_1] : memref<1x18x18x128xbf16, #tpu.memory_space<vmem>>, vector<1x8x16x128xbf16>
    %5 = vector.shape_cast %4 : vector<1x8x16x128xbf16> to vector<8x16x128xbf16>
    %6 = vector.shape_cast %5 : vector<8x16x128xbf16> to vector<128x128xbf16>
    %c0_2 = arith.constant 0 : index
    %c0_3 = arith.constant 0 : index
    %7 = vector.load %arg6[%c0_2, %c0_3] : memref<128x1152xbf16, #tpu.memory_space<vmem>>, vector<128x128xbf16>
    tpu.vector_store %arg6[%c0_2, %c0_3], %6 {strides = array<i32>} : memref<128x1152xbf16, #tpu.memory_space<vmem>>, vector<128x128xbf16>,
    %c0_i32_4 = arith.constant 0 : i32
    %8 = arith.addi %1, %c0_i32_4 : i32
    %c0_5 = arith.constant 0 : index
    %9 = arith.index_cast %8 : i32 to index
    %c1 = arith.constant 1 : index
    %c0_6 = arith.constant 0 : index
    %10 = vector.load %arg2[%c0_5, %9, %c1, %c0_6] : memref<1x18x18x128xbf16, #tpu.memory_space<vmem>>, vector<1x8x16x128xbf16>
    %11 = vector.shape_cast %10 : vector<1x8x16x128xbf16> to vector<8x16x128xbf16>
    %12 = vector.shape_cast %11 : vector<8x16x128xbf16> to vector<128x128xbf16>
    %c0_7 = arith.constant 0 : index
    %c128 = arith.constant 128 : index
    %13 = vector.load %arg6[%c0_7, %c128] : memref<128x1152xbf16, #tpu.memory_space<vmem>>, vector<128x128xbf16>
    tpu.vector_store %arg6[%c0_7, %c128], %12 {strides = array<i32>} : memref<128x1152xbf16, #tpu.memory_space<vmem>>, vector<128x128xbf16>,
    %c0_i32_8 = arith.constant 0 : i32
    %14 = arith.addi %1, %c0_i32_8 : i32
    %c0_9 = arith.constant 0 : index
    %15 = arith.index_cast %14 : i32 to index
    %c2 = arith.constant 2 : index
    %c0_10 = arith.constant 0 : index
    %16 = vector.load %arg2[%c0_9, %15, %c2, %c0_10] : memref<1x18x18x128xbf16, #tpu.memory_space<vmem>>, vector<1x8x16x128xbf16>
    %17 = vector.shape_cast %16 : vector<1x8x16x128xbf16> to vector<8x16x128xbf16>
    %18 = vector.shape_cast %17 : vector<8x16x128xbf16> to vector<128x128xbf16>
    %c0_11 = arith.constant 0 : index
    %c256 = arith.constant 256 : index
    %19 = vector.load %arg6[%c0_11, %c256] : memref<128x1152xbf16, #tpu.memory_space<vmem>>, vector<128x128xbf16>
    tpu.vector_store %arg6[%c0_11, %c256], %18 {strides = array<i32>} : memref<128x1152xbf16, #tpu.memory_space<vmem>>, vector<128x128xbf16>,
    %c1_i32 = arith.constant 1 : i32
    %20 = arith.addi %1, %c1_i32 : i32
    %c0_12 = arith.constant 0 : index
    %21 = arith.index_cast %20 : i32 to index
    %c0_13 = arith.constant 0 : index
    %c0_14 = arith.constant 0 : index
    %22 = vector.load %arg2[%c0_12, %21, %c0_13, %c0_14] : memref<1x18x18x128xbf16, #tpu.memory_space<vmem>>, vector<1x8x16x128xbf16>
    %23 = vector.shape_cast %22 : vector<1x8x16x128xbf16> to vector<8x16x128xbf16>
    %24 = vector.shape_cast %23 : vector<8x16x128xbf16> to vector<128x128xbf16>
    %c0_15 = arith.constant 0 : index
    %c384 = arith.constant 384 : index
    %25 = vector.load %arg6[%c0_15, %c384] : memref<128x1152xbf16, #tpu.memory_space<vmem>>, vector<128x128xbf16>
    tpu.vector_store %arg6[%c0_15, %c384], %24 {strides = array<i32>} : memref<128x1152xbf16, #tpu.memory_space<vmem>>, vector<128x128xbf16>,
    %c1_i32_16 = arith.constant 1 : i32
    %26 = arith.addi %1, %c1_i32_16 : i32
    %c0_17 = arith.constant 0 : index
    %27 = arith.index_cast %26 : i32 to index
    %c1_18 = arith.constant 1 : index
    %c0_19 = arith.constant 0 : index
    %28 = vector.load %arg2[%c0_17, %27, %c1_18, %c0_19] : memref<1x18x18x128xbf16, #tpu.memory_space<vmem>>, vector<1x8x16x128xbf16>
    %29 = vector.shape_cast %28 : vector<1x8x16x128xbf16> to vector<8x16x128xbf16>
    %30 = vector.shape_cast %29 : vector<8x16x128xbf16> to vector<128x128xbf16>
    %c0_20 = arith.constant 0 : index
    %c512 = arith.constant 512 : index
    %31 = vector.load %arg6[%c0_20, %c512] : memref<128x1152xbf16, #tpu.memory_space<vmem>>, vector<128x128xbf16>
    tpu.vector_store %arg6[%c0_20, %c512], %30 {strides = array<i32>} : memref<128x1152xbf16, #tpu.memory_space<vmem>>, vector<128x128xbf16>,
    %c1_i32_21 = arith.constant 1 : i32
    %32 = arith.addi %1, %c1_i32_21 : i32
    %c0_22 = arith.constant 0 : index
    %33 = arith.index_cast %32 : i32 to index
    %c2_23 = arith.constant 2 : index
    %c0_24 = arith.constant 0 : index
    %34 = vector.load %arg2[%c0_22, %33, %c2_23, %c0_24] : memref<1x18x18x128xbf16, #tpu.memory_space<vmem>>, vector<1x8x16x128xbf16>
    %35 = vector.shape_cast %34 : vector<1x8x16x128xbf16> to vector<8x16x128xbf16>
    %36 = vector.shape_cast %35 : vector<8x16x128xbf16> to vector<128x128xbf16>
    %c0_25 = arith.constant 0 : index
    %c640 = arith.constant 640 : index
    %37 = vector.load %arg6[%c0_25, %c640] : memref<128x1152xbf16, #tpu.memory_space<vmem>>, vector<128x128xbf16>
    tpu.vector_store %arg6[%c0_25, %c640], %36 {strides = array<i32>} : memref<128x1152xbf16, #tpu.memory_space<vmem>>, vector<128x128xbf16>,
    %c2_i32 = arith.constant 2 : i32
    %38 = arith.addi %1, %c2_i32 : i32
    %c0_26 = arith.constant 0 : index
    %39 = arith.index_cast %38 : i32 to index
    %c0_27 = arith.constant 0 : index
    %c0_28 = arith.constant 0 : index
    %40 = vector.load %arg2[%c0_26, %39, %c0_27, %c0_28] : memref<1x18x18x128xbf16, #tpu.memory_space<vmem>>, vector<1x8x16x128xbf16>
    %41 = vector.shape_cast %40 : vector<1x8x16x128xbf16> to vector<8x16x128xbf16>
    %42 = vector.shape_cast %41 : vector<8x16x128xbf16> to vector<128x128xbf16>
    %c0_29 = arith.constant 0 : index
    %c768 = arith.constant 768 : index
    %43 = vector.load %arg6[%c0_29, %c768] : memref<128x1152xbf16, #tpu.memory_space<vmem>>, vector<128x128xbf16>
    tpu.vector_store %arg6[%c0_29, %c768], %42 {strides = array<i32>} : memref<128x1152xbf16, #tpu.memory_space<vmem>>, vector<128x128xbf16>,
    %c2_i32_30 = arith.constant 2 : i32
    %44 = arith.addi %1, %c2_i32_30 : i32
    %c0_31 = arith.constant 0 : index
    %45 = arith.index_cast %44 : i32 to index
    %c1_32 = arith.constant 1 : index
    %c0_33 = arith.constant 0 : index
    %46 = vector.load %arg2[%c0_31, %45, %c1_32, %c0_33] : memref<1x18x18x128xbf16, #tpu.memory_space<vmem>>, vector<1x8x16x128xbf16>
    %47 = vector.shape_cast %46 : vector<1x8x16x128xbf16> to vector<8x16x128xbf16>
    %48 = vector.shape_cast %47 : vector<8x16x128xbf16> to vector<128x128xbf16>
    %c0_34 = arith.constant 0 : index
    %c896 = arith.constant 896 : index
    %49 = vector.load %arg6[%c0_34, %c896] : memref<128x1152xbf16, #tpu.memory_space<vmem>>, vector<128x128xbf16>
    tpu.vector_store %arg6[%c0_34, %c896], %48 {strides = array<i32>} : memref<128x1152xbf16, #tpu.memory_space<vmem>>, vector<128x128xbf16>,
    %c2_i32_35 = arith.constant 2 : i32
    %50 = arith.addi %1, %c2_i32_35 : i32
    %c0_36 = arith.constant 0 : index
    %51 = arith.index_cast %50 : i32 to index
    %c2_37 = arith.constant 2 : index
    %c0_38 = arith.constant 0 : index
    %52 = vector.load %arg2[%c0_36, %51, %c2_37, %c0_38] : memref<1x18x18x128xbf16, #tpu.memory_space<vmem>>, vector<1x8x16x128xbf16>
    %53 = vector.shape_cast %52 : vector<1x8x16x128xbf16> to vector<8x16x128xbf16>
    %54 = vector.shape_cast %53 : vector<8x16x128xbf16> to vector<128x128xbf16>
    %c0_39 = arith.constant 0 : index
    %c1024 = arith.constant 1024 : index
    %55 = vector.load %arg6[%c0_39, %c1024] : memref<128x1152xbf16, #tpu.memory_space<vmem>>, vector<128x128xbf16>
    tpu.vector_store %arg6[%c0_39, %c1024], %54 {strides = array<i32>} : memref<128x1152xbf16, #tpu.memory_space<vmem>>, vector<128x128xbf16>,
    %c0_40 = arith.constant 0 : index
    %c0_41 = arith.constant 0 : index
    %56 = vector.load %arg6[%c0_40, %c0_41] : memref<128x1152xbf16, #tpu.memory_space<vmem>>, vector<128x1152xbf16>
    %c0_42 = arith.constant 0 : index
    %c0_43 = arith.constant 0 : index
    %57 = vector.load %arg3[%c0_42, %c0_43] : memref<1152x128xbf16, #tpu.memory_space<vmem>>, vector<1152x128xbf16>
    %cst = arith.constant dense<0.000000e+00> : vector<128x128xf32>
    %58 = tpu.matmul %56, %57, %cst {dimension_numbers = #tpu.dot_dimension_numbers<[1], [0], [0], [1], [0, 0, 1, 1], [], []>} : vector<128x1152xbf16>, vector<1152x128xbf16>, vector<128x128xf32> -> vector<128x128xf32>
    %c0_44 = arith.constant 0 : index
    %c0_45 = arith.constant 0 : index
    %59 = vector.load %arg4[%c0_44, %c0_45] : memref<1x128xf32, #tpu.memory_space<vmem>>, vector<1x128xf32>
    %60 = vector.broadcast %59 : vector<1x128xf32> to vector<128x128xf32>
    %61 = arith.addf %58, %60 : vector<128x128xf32>
    %cst_46 = arith.constant 0.000000e+00 : f32
    %62 = vector.broadcast %cst_46 : f32 to vector<128x128xf32>
    %63 = arith.maximumf %61, %62 : vector<128x128xf32>
    %64 = vector.shape_cast %63 : vector<128x128xf32> to vector<8x16x128xf32>
    %c0_47 = arith.constant 0 : index
    %c0_48 = arith.constant 0 : index
    %c0_49 = arith.constant 0 : index
    %c0_50 = arith.constant 0 : index
    %65 = vector.load %arg5[%c0_47, %c0_48, %c0_49, %c0_50] : memref<1x8x16x128xf32, #tpu.memory_space<vmem>>, vector<1x8x16x128xf32>
    %66 = vector.shape_cast %65 : vector<1x8x16x128xf32> to vector<8x16x128xf32>
    %67 = vector.shape_cast %64 : vector<8x16x128xf32> to vector<1x8x16x128xf32>
    tpu.vector_store %arg5[%c0_47, %c0_48, %c0_49, %c0_50], %67 {strides = array<i32>} : memref<1x8x16x128xf32, #tpu.memory_space<vmem>>, vector<1x8x16x128xf32>,
    return
  }
  func.func @transform_0(%arg0: i32, %arg1: i32) -> (i32, i32, i32, i32) {
    %c0_i32 = arith.constant 0 : i32
    %c0_i32_0 = arith.constant 0 : i32
    %c0_i32_1 = arith.constant 0 : i32
    %c0_i32_2 = arith.constant 0 : i32
    return %arg0, %c0_i32, %c0_i32_0, %c0_i32_1 : i32, i32, i32, i32
  }
  func.func @transform_1(%arg0: i32, %arg1: i32) -> (i32, i32) {
    %c0_i32 = arith.constant 0 : i32
    %c0_i32_0 = arith.constant 0 : i32
    %c0_i32_1 = arith.constant 0 : i32
    return %c0_i32, %c0_i32_0 : i32, i32
  }
  func.func @transform_2(%arg0: i32, %arg1: i32) -> (i32, i32) {
    %c0_i32 = arith.constant 0 : i32
    %c0_i32_0 = arith.constant 0 : i32
    %c0_i32_1 = arith.constant 0 : i32
    return %c0_i32, %c0_i32_0 : i32, i32
  }
  func.func @transform_3(%arg0: i32, %arg1: i32) -> (i32, i32, i32, i32) {
    %c0_i32 = arith.constant 0 : i32
    %c0_i32_0 = arith.constant 0 : i32
    %c0_i32_1 = arith.constant 0 : i32
    return %arg0, %arg1, %c0_i32, %c0_i32_0 : i32, i32, i32, i32
  }
}

</mosaic_0001>

<bundles_post_ra>
// kernel: conv_module_forward.1
= control target key start
LH: loop header
LB: loop body
LE: loop exit
PB: predicated region body
PF: predicated region fallthrough
CT: control target
= control target key end

     0   :  { %s4081_s12 = smov 0   ;;  %s4083_s13 = smov 0   ;;  %s4930_s0 = inlined_call_operand.vmem [shape: bf16[2,18,18,128], index: 0, kind: input, shape index: {}]   ;;  %s4931_s1 = inlined_call_operand.vmem [shape: bf16[1152,128], index: 1, kind: input, shape index: {}]   ;;  %s4932_s2 = inlined_call_operand.vmem [shape: f32[1,128], index: 2, kind: input, shape index: {}]   ;;  %s4933_s3 = inlined_call_operand.vmem [shape: f32[2,16,16,128], index: 3, kind: output, shape index: {}]  }
   0x1   :  { %s4085_s14 = smov 0   ;;  %s4087_s15 = smov 0  }
   0x2   :  { %s4089_s16 = smov 0  }
   0x3 LB: > { %s22_s17 = sadd.s32 1, %s4051_s14  ;;  %s25_s18 = sadd.s32 1, %s4055_s15  ;;  %s4059_s16 = sphi %s4089_s16, %s13_s16   ;;  %s4055_s15 = sphi %s4087_s15, %s4941_s15   ;;  %s4051_s14 = sphi %s4085_s14, %s4940_s14   ;;  %s4047_s13 = sphi %s4083_s13, %s4939_s13   ;;  %s4043_s12 = sphi %s4081_s12, %s4938_s12  }
   0x4   : > { %p23_p0 = scmp.ge.s32.totalorder %s22_s17, 2  ;;  %p3067_p1 = scmp.ge.s32.totalorder %s4059_s16, 1 }
   0x5   : > { %p151_p2 = scmp.lt.s32.totalorder %s4059_s16, 5 }
   0x6   : > { %s4943_s17 = smov (%p23_p0, %s22_s17), 0  ;;  %s4945_s18 = smov (!%p23_p0, %s25_s18), %s4055_s15 }
   0x7   : > { %p152_p3 = pnand %p3067_p1, %p151_p2  ;;  %p27_p4 = scmp.ge.s32.totalorder %s4945_s18, 2 }
   0x8   : > { %p180_p5 = scmp.lt.s32.totalorder (!%p152_p3), %s4047_s13, 1  ;;  %s3810_s23 = smul.u32 (!%p152_p3), 96, %s4043_s12 }
   0x9   : > { %s4947_s18 = smov (%p27_p4, %s4945_s18), 0  ;;  %155 = sbr.rel (%p152_p3) target bundleno = 467 (0x1d3), region = 32 }
   0xe   : > { %v3890_v0 = vld [vmem:[%s4931_s1 + $0x38] sm:$0xff]  ;;  %v3889_v1 = vld [vmem:[%s4931_s1 + $0x30] sm:$0xff]  ;;  %s4949_s13 = smov (!%p180_p5, %s4047_s13), 1  ;;  %v3888_v2 = vld [vmem:[%s4931_s1 + $0x28] sm:$0xff]  ;;  %vm531_vm0 = vcmask 1042432   ;;  %vm532_vm2 = vcmask 1046532  }
   0xf   : > { %3955 = vmatpush.bf16.msra.mxu1 %v3890_v0  ;;  %3956 = vmatpush.bf16.msra.mxu2 %v3890_v0  ;;  %s3979_s24 = smul.u32 216, %s4949_s13  ;;  %v3887_v7 = vld [vmem:[%s4931_s1 + $0x20] sm:$0xff]  ;;  %v3886_v12 = vld [vmem:[%s4931_s1 + $0x18] sm:$0xff]  ;;  %v3885_v17 = vld [vmem:[%s4931_s1 + $0x10] sm:$0xff]  ;;  %vm256_vm1 = vsmask.f32 3328 }
  0x10   : > { %3957 = vmatpush.bf16.msra.mxu3 %v3890_v0  ;;  %2490 = vmatpush.bf16.msra.mxu0 %v3890_v0  ;;  %v3884_v22 = vld [vmem:[%s4931_s1 + $0x8] sm:$0xff]  ;;  %v3883_v29 = vld [vmem:[%s4931_s1] sm:$0xff]  ;;  %v3906_v38 = vld [vmem:[%s4931_s1 + $0xb8] sm:$0xff]  ;;  %vm257_vm3 = vsmask.f32 7440  ;;  %s3071_s19 = sshll.u32 %s4949_s13, 5 }
  0x11   : > { %s184_s29 = scalar_lea.vmem %s4930_s0, %s3979_s24  ;;  %v3898_v39 = vld [vmem:[%s4931_s1 + $0x78] sm:$0xff]  ;;  %v3905_v47 = vld [vmem:[%s4931_s1 + $0xb0] sm:$0xff]  ;;  %vm4187_vm4 = vmor %vm531_vm0, %vm532_vm2 }
  0x12   : > { %s4129_s30 = scalar_lea.vmem %s184_s29, %s3810_s23  ;;  %v3914_v40 = vld [vmem:[%s4931_s1 + $0xf8] sm:$0xff]  ;;  %v3897_v50 = vld [vmem:[%s4931_s1 + $0x70] sm:$0xff]  ;;  %vm4206_vm5 = vmor %vm256_vm1, %vm257_vm3 }
  0x13   : > { %3958 = vmatpush.bf16.msra.mxu1 %v3889_v1  ;;  %3959 = vmatpush.bf16.msra.mxu2 %v3889_v1  ;;  %v204_v3 = vld [vmem:[%s4129_s30 + $0x18] sm:$0xf]  ;;  %v205_v4 = vld [vmem:[%s4129_s30 + $0x1c] sm:$0xf]  ;;  %v208_v5 = vld [vmem:[%s4129_s30 + $0x30] sm:$0xf] }
  0x14   : > { %3960 = vmatpush.bf16.msra.mxu3 %v3889_v1  ;;  %2491 = vmatpush.bf16.msra.mxu0 %v3889_v1  ;;  %220 = vst [vmem:[#allocation2 + $0x90] sm:$0xf] %v204_v3  ;;  %v209_v6 = vld [vmem:[%s4129_s30 + $0x34] sm:$0xf]  ;;  %v212_v8 = vld [vmem:[%s4129_s30 + $0x48] sm:$0xf] }
  0x15   : > { %221 = vst [vmem:[#allocation2 + $0xb4] sm:$0xf] %v205_v4  ;;  %v213_v9 = vld [vmem:[%s4129_s30 + $0x4c] sm:$0xf]  ;;  %v200_v10 = vld [vmem:[%s4129_s30] sm:$0xf] }
  0x16   : > { %224 = vst [vmem:[#allocation2 + $0x120] sm:$0xf] %v208_v5  ;;  %v201_v11 = vld [vmem:[%s4129_s30 + $0x4] sm:$0xf]  ;;  %v207_v14 = vld [vmem:[%s4129_s30 + $0x28] sm:$0xf] }
  0x17   : > { %3961 = vmatpush.bf16.msra.mxu1 %v3888_v2  ;;  %3962 = vmatpush.bf16.msra.mxu2 %v3888_v2  ;;  %225 = vst [vmem:[#allocation2 + $0x144] sm:$0xf] %v209_v6  ;;  %v206_v13 = vld [vmem:[%s4129_s30 + $0x24] sm:$0xf]  ;;  %v210_v15 = vld [vmem:[%s4129_s30 + $0x3c] sm:$0xf] }
  0x18   : > { %3963 = vmatpush.bf16.msra.mxu3 %v3888_v2  ;;  %2492 = vmatpush.bf16.msra.mxu0 %v3888_v2  ;;  %228 = vst [vmem:[#allocation2 + $0x1b0] sm:$0xf] %v212_v8  ;;  %v211_v16 = vld [vmem:[%s4129_s30 + $0x40] sm:$0xf]  ;;  %v214_v18 = vld [vmem:[%s4129_s30 + $0x54] sm:$0xf] }
  0x19   : > { %229 = vst [vmem:[#allocation2 + $0x1d4] sm:$0xf] %v213_v9  ;;  %v215_v19 = vld [vmem:[%s4129_s30 + $0x58] sm:$0xf]  ;;  %v202_v20 = vld [vmem:[%s4129_s30 + $0xc] sm:$0xf] }
  0x1a   : > { %216 = vst [vmem:[#allocation2] sm:$0xf] %v200_v10  ;;  %v203_v21 = vld [vmem:[%s4129_s30 + $0x10] sm:$0xf]  ;;  %v232_v30 = vld [vmem:[%s4129_s30] sm:$0xf] }
  0x1b   : > { %3964 = vmatpush.bf16.msra.mxu1 %v3887_v7  ;;  %3965 = vmatpush.bf16.msra.mxu2 %v3887_v7  ;;  %217 = vst [vmem:[#allocation2 + $0x24] sm:$0xf] %v201_v11  ;;  %v3306_v23 = vld [vmem:[#allocation2 + $0x90] sm:$0xf]  ;;  %v233_v31 = vld [vmem:[%s4129_s30 + $0x4] sm:$0xf] }
  0x1c   : > { %3966 = vmatpush.bf16.msra.mxu3 %v3887_v7  ;;  %2493 = vmatpush.bf16.msra.mxu0 %v3887_v7  ;;  %222 = vst [vmem:[#allocation2 + $0xd8] sm:$0xf] %v206_v13  ;;  %v3833_v24 = vld [vmem:[#allocation2 + $0xb0] sm:$0xf0]  ;;  %v234_v34 = vld [vmem:[%s4129_s30 + $0x8] sm:$0x1] }
  0x1d   : > { %223 = vst [vmem:[#allocation2 + $0xfc] sm:$0xf] %v207_v14  ;;  %v3378_v25 = vld [vmem:[#allocation2 + $0x120] sm:$0xf]  ;;  %v3307_v35 = vor.u32 %v3833_v24, %v3306_v23  ;;  %v3922_v41 = vld [vmem:[%s4931_s1 + $0x138] sm:$0xff]  ;;  %v260_v42 = vshrl.u32 %v232_v30, 16 }
  0x1e   : > { %226 = vst [vmem:[#allocation2 + $0x168] sm:$0xf] %v210_v15  ;;  %v3851_v26 = vld [vmem:[#allocation2 + $0x140] sm:$0xf0]  ;;  %v263_v43 = vshll.u32 %v232_v30, 16  ;;  %v269_v44 = vshll.u32 %v233_v31, 16 }
  0x1f   : > { %3967 = vmatpush.bf16.msra.mxu1 %v3886_v12  ;;  %3968 = vmatpush.bf16.msra.mxu2 %v3886_v12  ;;  %227 = vst [vmem:[#allocation2 + $0x18c] sm:$0xf] %v211_v16  ;;  %v3450_v27 = vld [vmem:[#allocation2 + $0x1b0] sm:$0xf]  ;;  %v3379_v36 = vor.u32 %v3851_v26, %v3378_v25  ;;  %v273_v45 = vshrl.u32 %v233_v31, 16  ;;  %v279_v48 = vshll.u32 %v234_v34, 16 }
  0x20   : > { %3969 = vmatpush.bf16.msra.mxu3 %v3886_v12  ;;  %2494 = vmatpush.bf16.msra.mxu0 %v3886_v12  ;;  %230 = vst [vmem:[#allocation2 + $0x1f8] sm:$0xf] %v214_v18  ;;  %v3869_v28 = vld [vmem:[#allocation2 + $0x1d0] sm:$0xf0]  ;;  %v483_v49 = vld [vmem:[%s4129_s30] sm:$0xe] }
  0x21   : > { %231 = vst [vmem:[#allocation2 + $0x21c] sm:$0xf] %v215_v19  ;;  %v3234_v32 = vld [vmem:[#allocation2] sm:$0xf]  ;;  %v3451_v37 = vor.u32 %v3869_v28, %v3450_v27  ;;  %v262_v51 = vrot.slane %v260_v42, 4  ;;  %v265_v52 = vrot.slane %v263_v43, 5 }
  0x22   : > { %218 = vst [vmem:[#allocation2 + $0x48] sm:$0xf] %v202_v20  ;;  %v3815_v33 = vld [vmem:[#allocation2 + $0x20] sm:$0xf0]  ;;  %v271_v53 = vrot.slane %v269_v44, 5  ;;  %v275_v54 = vrot.slane %v273_v45, 4 }
  0x23   : > { %3970 = vmatpush.bf16.msra.mxu1 %v3885_v17  ;;  %3971 = vmatpush.bf16.msra.mxu2 %v3885_v17  ;;  %219 = vst [vmem:[#allocation2 + $0x6c] sm:$0xf] %v203_v21  ;;  %v3235_v46 = vor.u32 %v3815_v33, %v3234_v32  ;;  %v484_v55 = vld [vmem:[%s4129_s30 + $0x4] sm:$0xf]  ;;  %v485_v56 = vld [vmem:[%s4129_s30 + $0x8] sm:$0x1]  ;;  %v266_v60 = vor.u32 %v265_v52, %v262_v51 }
  0x24   : > { %3972 = vmatpush.bf16.msra.mxu3 %v3885_v17  ;;  %2495 = vmatpush.bf16.msra.mxu0 %v3885_v17  ;;  %v3913_v58 = vld [vmem:[%s4931_s1 + $0xf0] sm:$0xff]  ;;  %v3076_v61 = vrot.slane %v483_v49, 9  ;;  %v536_v62 = vrot.slane %v484_v55, 5  ;;  %v539_v63 = vrot.slane %v485_v56, 5  ;;  %v3086_v0 = vld [vmem:[%s4129_s30 + $0xc] sm:$0xf]  ;;  %v276_v4 = vor.u32 %v275_v54, %v271_v53 }
  0x25   : > { %v3921_v59 = vld [vmem:[%s4931_s1 + $0x130] sm:$0xff]  ;;  %v3904_v1 = vld [vmem:[%s4931_s1 + $0xa8] sm:$0xff]  ;;  %v281_v5 = vrot.slane %v279_v48, 5  ;;  %642 = vst [vmem:[#allocation2 + $0xc] sm:$0xf] %v3086_v0  ;;  %v267_v8 = vrot.slane %v266_v60, 4 }
  0x26   : > { %v3896_v2 = vld [vmem:[%s4931_s1 + $0x68] sm:$0xff]  ;;  %v3087_v6 = vld [vmem:[%s4129_s30 + $0x10] sm:$0xf]  ;;  %v4211_v7 = vld [vmem:[#allocation2 + $0xd8] sm:$0xf]  ;;  %v537_v9 = vsel %vm4187_vm4, %v3076_v61, %v536_v62  ;;  %v538_v10 = vrot.slane %v536_v62, 4 }
  0x27   : > { %3973 = vmatpush.bf16.msra.mxu1 %v3884_v22  ;;  %3974 = vmatpush.bf16.msra.mxu2 %v3884_v22  ;;  %643 = vst [vmem:[#allocation2 + $0x30] sm:$0xf] %v3087_v6  ;;  %v3102_v11 = vld [vmem:[%s4129_s30 + $0xc] sm:$0xf]  ;;  %v277_v12 = vrot.slane %v276_v4, 4  ;;  %v272_v18 = vsel %vm4206_vm5, %v267_v8, %v271_v53  ;;  %v3903_v23 = vld [vmem:[%s4931_s1 + $0xa0] sm:$0xff] }
  0x28   : > { %3975 = vmatpush.bf16.msra.mxu3 %v3884_v22  ;;  %2496 = vmatpush.bf16.msra.mxu0 %v3884_v22  ;;  %606 = vst [vmem:[#allocation2 + $0x8] sm:$0xf] %v537_v9  ;;  %v3103_v13 = vld [vmem:[%s4129_s30 + $0x10] sm:$0xf]  ;;  %v683_v14 = vshrl.u32 %v3102_v11, 16  ;;  %v3912_v15 = vld [vmem:[%s4931_s1 + $0xe8] sm:$0xff]  ;;  %v540_v19 = vsel %vm4187_vm4, %v538_v10, %v539_v63 }
  0x29   : > { %v3920_v16 = vld [vmem:[%s4931_s1 + $0x128] sm:$0xff]  ;;  %v4223_v17 = vld [vmem:[#allocation2 + $0xf8] sm:$0xf0]  ;;  %v3104_v20 = vld [vmem:[%s4129_s30 + $0x14] sm:$0x1]  ;;  %v686_v21 = vshll.u32 %v3102_v11, 16  ;;  %v282_v26 = vsel %vm4206_vm5, %v277_v12, %v281_v5 }
  0x2a   : > { %v692_v22 = vshll.u32 %v3103_v13, 16  ;;  %v4233_v24 = vld [vmem:[#allocation2 + $0x168] sm:$0xf]  ;;  %v4235_v25 = vld [vmem:[#allocation2 + $0x188] sm:$0xf0]  ;;  %v685_v27 = vrot.slane %v683_v14, 4 }
  0x2b   : > { %3976 = vmatpush.bf16.msra.mxu1 %v3883_v29  ;;  %3977 = vmatpush.bf16.msra.mxu2 %v3883_v29  ;;  %467 = vst [vmem:[#allocation2 + $0x4] sm:$0xf] %v272_v18  ;;  %v696_v28 = vshrl.u32 %v3103_v13, 16  ;;  %v4239_v30 = vld [vmem:[#allocation2 + $0x1f8] sm:$0xf]  ;;  %v688_v32 = vrot.slane %v686_v21, 5  ;;  %v3415_v52 = vor.u32 %v4235_v25, %v4233_v24 }
  0x2c   : > { %3978 = vmatpush.bf16.msra.mxu3 %v3883_v29  ;;  %2497 = vmatpush.bf16.msra.mxu0 %v3883_v29  ;;  %v702_v29 = vshll.u32 %v3104_v20, 16  ;;  %v4241_v31 = vld [vmem:[#allocation2 + $0x218] sm:$0xf0]  ;;  %468 = vst [vmem:[#allocation2 + $0x28] sm:$0xf] %v282_v26  ;;  %v694_v33 = vrot.slane %v692_v22, 5 }
  0x2d   : > { %v235_v34 = vld [vmem:[%s4129_s30 + $0xc] sm:$0xf]  ;;  %607 = vst [vmem:[#allocation2 + $0x2c] sm:$0xf] %v540_v19  ;;  %v237_v42 = vld [vmem:[%s4129_s30 + $0x14] sm:$0x1] }
  0x2e   : > { %2508 = vmatmul.bf16.vlgmr.msra.gmra.mxu1 %v3307_v35  ;;  %2518 = vmatmul.bf16.vlgmr.msra.gmra.mxu2 %v3379_v36  ;;  %v3895_v35 = vld [vmem:[%s4931_s1 + $0x60] sm:$0xff]  ;;  %v3343_v36 = vor.u32 %v4223_v17, %v4211_v7  ;;  %v284_v43 = vshrl.u32 %v235_v34, 16  ;;  %v287_v44 = vshll.u32 %v235_v34, 16  ;;  %v3824_v45 = vld [vmem:[#allocation2 + $0x68] sm:$0xf0]  ;;  %v303_v49 = vshll.u32 %v237_v42, 16 }
  0x2f   : > { %2588 = vmatpush.bf16.msrb.mxu2 %v3906_v38  ;;  %2539 = vmatpush.bf16.msrb.mxu1 %v3898_v39  ;;  %v698_v38 = vrot.slane %v696_v28, 4  ;;  %v236_v39 = vld [vmem:[%s4129_s30 + $0x10] sm:$0xf]  ;;  %v3919_v51 = vld [vmem:[%s4931_s1 + $0x120] sm:$0xff]  ;;  %v3902_v53 = vld [vmem:[%s4931_s1 + $0x98] sm:$0xff] }
  0x30   : > { %2528 = vmatmul.bf16.vlgmr.msra.gmra.mxu3 %v3451_v37  ;;  %2498 = vmatmul.bf16.vlgmr.msra.gmra.mxu0 %v3235_v46  ;;  %v4249_v37 = vld [vmem:[#allocation2 + $0x48] sm:$0xf]  ;;  %v297_v48 = vshrl.u32 %v236_v39, 16  ;;  %v286_v55 = vrot.slane %v284_v43, 4  ;;  %v289_v56 = vrot.slane %v287_v44, 5  ;;  %v305_v4 = vrot.slane %v303_v49, 5 }
  0x31   : > { %2637 = vmatpush.bf16.msrb.mxu3 %v3914_v40  ;;  %2686 = vmatpush.bf16.msrb.mxu0 %v3922_v41  ;;  %v689_v40 = vor.u32 %v688_v32, %v685_v27  ;;  %v704_v41 = vrot.slane %v702_v29, 5  ;;  %v699_v46 = vor.u32 %v698_v38, %v694_v33  ;;  %v486_v63 = vld [vmem:[%s4129_s30 + $0xc] sm:$0xe]  ;;  %v3271_v0 = vor.u32 %v3824_v45, %v4249_v37  ;;  %v487_v5 = vld [vmem:[%s4129_s30 + $0x10] sm:$0xf]  ;;  %v3910_v11 = vld [vmem:[%s4931_s1 + $0xd8] sm:$0xff] }
  0x32   : > { %v299_v62 = vrot.slane %v297_v48, 4  ;;  %v488_v6 = vld [vmem:[%s4129_s30 + $0x14] sm:$0x1]  ;;  %v3077_v9 = vrot.slane %v486_v63, 9  ;;  %v543_v10 = vrot.slane %v487_v5, 5  ;;  %v3918_v12 = vld [vmem:[%s4931_s1 + $0x118] sm:$0xff] }
  0x33   : > { %2589 = vmatpush.bf16.msrb.mxu2 %v3905_v47  ;;  %2540 = vmatpush.bf16.msrb.mxu1 %v3897_v50  ;;  %v293_v47 = vshll.u32 %v236_v39, 16  ;;  %v3911_v50 = vld [vmem:[%s4931_s1 + $0xe0] sm:$0xff]  ;;  %v690_v54 = vrot.slane %v689_v40, 4  ;;  %v700_v60 = vrot.slane %v699_v46, 4  ;;  %v546_v14 = vrot.slane %v488_v6, 5  ;;  %v3909_v21 = vld [vmem:[%s4931_s1 + $0xd0] sm:$0xff] }
  0x34   : > { %v544_v18 = vsel %vm4187_vm4, %v3077_v9, %v543_v10  ;;  %v545_v19 = vrot.slane %v543_v10, 4  ;;  %v3088_v20 = vld [vmem:[%s4129_s30 + $0x18] sm:$0xf]  ;;  %v3106_v25 = vld [vmem:[%s4129_s30 + $0x1c] sm:$0xf]  ;;  %v3917_v26 = vld [vmem:[%s4931_s1 + $0x110] sm:$0xff] }
  0x35   : > { %2638 = vmatpush.bf16.msrb.mxu3 %v3913_v58  ;;  %2687 = vmatpush.bf16.msrb.mxu0 %v3921_v59  ;;  %v3487_v58 = vor.u32 %v4241_v31, %v4239_v30  ;;  %v3894_v59 = vld [vmem:[%s4931_s1 + $0x58] sm:$0xff]  ;;  %v295_v61 = vrot.slane %v293_v47, 5  ;;  %v705_v7 = vsel %vm4206_vm5, %v700_v60, %v704_v41  ;;  %608 = vst [vmem:[#allocation2 + $0x50] sm:$0xf] %v544_v18  ;;  %v3107_v29 = vld [vmem:[%s4129_s30 + $0x20] sm:$0x1] }
  0x36   : > { %891 = vst [vmem:[#allocation2 + $0x34] sm:$0xf] %v705_v7  ;;  %v3105_v24 = vld [vmem:[%s4129_s30 + $0x18] sm:$0xf]  ;;  %v547_v28 = vsel %vm4187_vm4, %v545_v19, %v546_v14  ;;  %v716_v32 = vshll.u32 %v3106_v25, 16  ;;  %v726_v34 = vshll.u32 %v3107_v29, 16 }
  0x37   : > { %2590 = vmatpush.bf16.msrb.mxu2 %v3904_v1  ;;  %2541 = vmatpush.bf16.msrb.mxu1 %v3896_v2  ;;  %v695_v1 = vsel %vm4206_vm5, %v690_v54, %v694_v33  ;;  %v290_v2 = vor.u32 %v289_v56, %v286_v55  ;;  %v300_v8 = vor.u32 %v299_v62, %v295_v61  ;;  %v707_v30 = vshrl.u32 %v3105_v24, 16  ;;  %v3908_v38 = vld [vmem:[%s4931_s1 + $0xc8] sm:$0xff]  ;;  %v3899_v42 = vld [vmem:[%s4931_s1 + $0x80] sm:$0xff]  ;;  %v4328_v45 = vld [vmem:[#allocation2 + $0x2c] sm:$0xf0] }
  0x38   : > { %890 = vst [vmem:[#allocation2 + $0x10] sm:$0xf] %v695_v1  ;;  %v710_v31 = vshll.u32 %v3105_v24, 16  ;;  %v720_v33 = vshrl.u32 %v3106_v25, 16  ;;  %v3916_v39 = vld [vmem:[%s4931_s1 + $0x108] sm:$0xff]  ;;  %v718_v41 = vrot.slane %v716_v32, 5 }
  0x39   : > { %2639 = vmatpush.bf16.msrb.mxu3 %v3912_v15  ;;  %2688 = vmatpush.bf16.msrb.mxu0 %v3920_v16  ;;  %v291_v13 = vrot.slane %v290_v2, 4  ;;  %v3901_v15 = vld [vmem:[%s4931_s1 + $0x90] sm:$0xff]  ;;  %v301_v17 = vrot.slane %v300_v8, 4  ;;  %609 = vst [vmem:[#allocation2 + $0x74] sm:$0xf] %v547_v28  ;;  %v709_v37 = vrot.slane %v707_v30, 4 }
  0x3a   : > { %v3893_v16 = vld [vmem:[%s4931_s1 + $0x50] sm:$0xff]  ;;  %644 = vst [vmem:[#allocation2 + $0x54] sm:$0xf] %v3088_v20  ;;  %v712_v40 = vrot.slane %v710_v31, 5  ;;  %v3891_v43 = vld [vmem:[%s4931_s1 + $0x40] sm:$0xff]  ;;  %v722_v46 = vrot.slane %v720_v33, 4 }
  0x3b   : > { %2591 = vmatpush.bf16.msrb.mxu2 %v3903_v23  ;;  %2542 = vmatpush.bf16.msrb.mxu1 %v3895_v35  ;;  %v296_v22 = vsel %vm4206_vm5, %v291_v13, %v295_v61  ;;  %v3089_v23 = vld [vmem:[%s4129_s30 + $0x1c] sm:$0xf]  ;;  %v306_v27 = vsel %vm4206_vm5, %v301_v17, %v305_v4  ;;  %v3900_v35 = vld [vmem:[%s4931_s1 + $0x88] sm:$0xff]  ;;  %v728_v47 = vrot.slane %v726_v34, 5  ;;  %v4330_v48 = vld [vmem:[#allocation2 + $0x4] sm:$0xf] }
  0x3c   : > { %469 = vst [vmem:[#allocation2 + $0x4c] sm:$0xf] %v296_v22  ;;  %v4326_v44 = vld [vmem:[#allocation2 + $0xc] sm:$0xf]  ;;  %v713_v49 = vor.u32 %v712_v40, %v709_v37  ;;  %v4337_v54 = vld [vmem:[#allocation2 + $0x8] sm:$0xf]  ;;  %v723_v56 = vor.u32 %v722_v46, %v718_v41 }
  0x3d   : > { %2640 = vmatpush.bf16.msrb.mxu3 %v3911_v50  ;;  %2689 = vmatpush.bf16.msrb.mxu0 %v3919_v51  ;;  %470 = vst [vmem:[#allocation2 + $0x70] sm:$0xf] %v306_v27  ;;  %v238_v50 = vld [vmem:[%s4129_s30 + $0x18] sm:$0xf]  ;;  %v239_v51 = vld [vmem:[%s4129_s30 + $0x1c] sm:$0xf]  ;;  %v3247_v10 = vor.u32 %v4326_v44, %v4328_v45 }
  0x3e   : > { %2513 = vmatmul.bf16.gmra.mxu1 %v3343_v36  ;;  %2523 = vmatmul.bf16.gmra.mxu2 %v3415_v52  ;;  %v3892_v36 = vld [vmem:[%s4931_s1 + $0x48] sm:$0xff]  ;;  %645 = vst [vmem:[#allocation2 + $0x78] sm:$0xf] %v3089_v23  ;;  %v240_v52 = vld [vmem:[%s4129_s30 + $0x20] sm:$0x1]  ;;  %v3938_v55 = vld [vmem:[%s4931_s1 + $0x1b8] sm:$0xff] }
  0x3f   : > { %2592 = vmatpush.bf16.msrb.mxu2 %v3902_v53  ;;  %2543 = vmatpush.bf16.msrb.mxu1 %v3894_v59  ;;  %v4335_v53 = vld [vmem:[#allocation2 + $0x24] sm:$0xf0]  ;;  %v311_v59 = vshll.u32 %v238_v50, 16  ;;  %v317_v60 = vshll.u32 %v239_v51, 16  ;;  %v3907_v61 = vld [vmem:[%s4931_s1 + $0xc0] sm:$0xff]  ;;  %v3930_v63 = vld [vmem:[%s4931_s1 + $0x178] sm:$0xff] }
  0x40   : > { %2533 = vmatmul.bf16.gmra.mxu3 %v3487_v58  ;;  %2503 = vmatmul.bf16.gmra.mxu0 %v3271_v0  ;;  %v308_v58 = vshrl.u32 %v238_v50, 16  ;;  %v3816_v62 = vld [vmem:[#allocation2 + $0x28] sm:$0xf0]  ;;  %v714_v0 = vrot.slane %v713_v49, 4  ;;  %v321_v1 = vshrl.u32 %v239_v51, 16  ;;  %v327_v2 = vshll.u32 %v240_v52, 16 }
  0x41   : > { %2641 = vmatpush.bf16.msrb.mxu3 %v3910_v11  ;;  %2690 = vmatpush.bf16.msrb.mxu0 %v3918_v12  ;;  %v3250_v4 = vld [vmem:[#allocation2 + $0x10] sm:$0xf]  ;;  %v724_v5 = vrot.slane %v723_v56, 4  ;;  %v313_v7 = vrot.slane %v311_v59, 5  ;;  %v319_v8 = vrot.slane %v317_v60, 5  ;;  %v3915_v9 = vld [vmem:[%s4931_s1 + $0x100] sm:$0xff] }
  0x42   : > { %v310_v6 = vrot.slane %v308_v58, 4  ;;  %v3817_v11 = vld [vmem:[#allocation2 + $0x30] sm:$0xf0]  ;;  %v719_v12 = vsel %vm4206_vm5, %v714_v0, %v718_v41  ;;  %v323_v13 = vrot.slane %v321_v1, 4  ;;  %v489_v14 = vld [vmem:[%s4129_s30 + $0x18] sm:$0xe] }
  0x43   : > { %2593 = vmatpush.bf16.msrb.mxu2 %v3901_v15  ;;  %2544 = vmatpush.bf16.msrb.mxu1 %v3893_v16  ;;  %v3239_v15 = vor.u32 %v4330_v48, %v4335_v53  ;;  %v3946_v16 = vld [vmem:[%s4931_s1 + $0x1f8] sm:$0xff]  ;;  %v729_v18 = vsel %vm4206_vm5, %v724_v5, %v728_v47  ;;  %892 = vst [vmem:[#allocation2 + $0x58] sm:$0xf] %v719_v12  ;;  %v3937_v22 = vld [vmem:[%s4931_s1 + $0x1b0] sm:$0xff]  ;;  %v329_v24 = vrot.slane %v327_v2, 5  ;;  %v3078_v30 = vrot.slane %v489_v14, 9 }
  0x44   : > { %v3954_v17 = vld [vmem:[%s4931_s1 + $0x238] sm:$0xff]  ;;  %v314_v19 = vor.u32 %v313_v7, %v310_v6  ;;  %893 = vst [vmem:[#allocation2 + $0x7c] sm:$0xf] %v729_v18  ;;  %v324_v23 = vor.u32 %v323_v13, %v319_v8  ;;  %v491_v25 = vld [vmem:[%s4129_s30 + $0x20] sm:$0x1]  ;;  %v3945_v27 = vld [vmem:[%s4931_s1 + $0x1f0] sm:$0xff] }
  0x45   : > { %2642 = vmatpush.bf16.msrb.mxu3 %v3909_v21  ;;  %2691 = vmatpush.bf16.msrb.mxu0 %v3917_v26  ;;  %v490_v20 = vld [vmem:[%s4129_s30 + $0x1c] sm:$0xf]  ;;  %v3243_v21 = vor.u32 %v3816_v62, %v4337_v54  ;;  %v3251_v26 = vor.u32 %v3817_v11, %v3250_v4  ;;  %v3929_v28 = vld [vmem:[%s4931_s1 + $0x170] sm:$0xff]  ;;  %v3090_v32 = vld [vmem:[%s4129_s30 + $0x24] sm:$0xf]  ;;  %v553_v34 = vrot.slane %v491_v25, 5 }
  0x46   : > { %v315_v29 = vrot.slane %v314_v19, 4  ;;  %v550_v31 = vrot.slane %v490_v20, 5  ;;  %v325_v33 = vrot.slane %v324_v23, 4  ;;  %646 = vst [vmem:[#allocation2 + $0x9c] sm:$0xf] %v3090_v32  ;;  %v3936_v48 = vld [vmem:[%s4931_s1 + $0x1a8] sm:$0xff] }
  0x47   : > { %2594 = vmatpush.bf16.msrb.mxu2 %v3900_v35  ;;  %2545 = vmatpush.bf16.msrb.mxu1 %v3892_v36  ;;  %v3091_v35 = vld [vmem:[%s4129_s30 + $0x28] sm:$0xf]  ;;  %v3953_v36 = vld [vmem:[%s4931_s1 + $0x230] sm:$0xff]  ;;  %v3108_v40 = vld [vmem:[%s4129_s30 + $0x24] sm:$0xf] }
  0x48   : > { %v320_v37 = vsel %vm4206_vm5, %v315_v29, %v319_v8  ;;  %647 = vst [vmem:[#allocation2 + $0xc0] sm:$0xf] %v3091_v35  ;;  %v330_v41 = vsel %vm4206_vm5, %v325_v33, %v329_v24  ;;  %v731_v45 = vshrl.u32 %v3108_v40, 16  ;;  %v734_v46 = vshll.u32 %v3108_v40, 16  ;;  %v3928_v56 = vld [vmem:[%s4931_s1 + $0x168] sm:$0xff] }
  0x49   : > { %2643 = vmatpush.bf16.msrb.mxu3 %v3908_v38  ;;  %2692 = vmatpush.bf16.msrb.mxu0 %v3916_v39  ;;  %v551_v38 = vsel %vm4187_vm4, %v3078_v30, %v550_v31  ;;  %v552_v39 = vrot.slane %v550_v31, 4  ;;  %471 = vst [vmem:[#allocation2 + $0x94] sm:$0xf] %v320_v37  ;;  %v3952_v58 = vld [vmem:[%s4931_s1 + $0x228] sm:$0xff]  ;;  %v241_v60 = vld [vmem:[%s4129_s30 + $0x24] sm:$0xf] }
  0x4a   : > { %472 = vst [vmem:[#allocation2 + $0xb8] sm:$0xf] %v330_v41  ;;  %v733_v51 = vrot.slane %v731_v45, 4  ;;  %v736_v52 = vrot.slane %v734_v46, 5  ;;  %v3820_v62 = vld [vmem:[#allocation2 + $0x4c] sm:$0xf] }
  0x4b   : > { %2595 = vmatpush.bf16.msrb.mxu2 %v3899_v42  ;;  %2546 = vmatpush.bf16.msrb.mxu1 %v3891_v43  ;;  %v3109_v42 = vld [vmem:[%s4129_s30 + $0x28] sm:$0xf]  ;;  %v3110_v43 = vld [vmem:[%s4129_s30 + $0x2c] sm:$0x1]  ;;  %v554_v44 = vsel %vm4187_vm4, %v552_v39, %v553_v34  ;;  %610 = vst [vmem:[#allocation2 + $0x98] sm:$0xf] %v551_v38 }
  0x4c   : > { %v740_v47 = vshll.u32 %v3109_v42, 16  ;;  %v744_v49 = vshrl.u32 %v3109_v42, 16  ;;  %v750_v50 = vshll.u32 %v3110_v43, 16  ;;  %611 = vst [vmem:[#allocation2 + $0xbc] sm:$0xf] %v554_v44  ;;  %v737_v59 = vor.u32 %v736_v52, %v733_v51  ;;  %v3935_v51 = vld [vmem:[%s4931_s1 + $0x1a0] sm:$0xff] }
  0x4d   : > { %2644 = vmatpush.bf16.msrb.mxu3 %v3907_v61  ;;  %2693 = vmatpush.bf16.msrb.mxu0 %v3915_v9  ;;  %v242_v61 = vld [vmem:[%s4129_s30 + $0x28] sm:$0xf]  ;;  %v243_v2 = vld [vmem:[%s4129_s30 + $0x2c] sm:$0x1]  ;;  %v332_v4 = vshrl.u32 %v241_v60, 16  ;;  %v335_v5 = vshll.u32 %v241_v60, 16 }
  0x4e   : > { %2547 = vmatmul.bf16.vlgmr.msrb.gmra.mxu1 %v3239_v15  ;;  %2596 = vmatmul.bf16.vlgmr.msrb.gmra.mxu2 %v3243_v21  ;;  %v742_v53 = vrot.slane %v740_v47, 5  ;;  %v746_v54 = vrot.slane %v744_v49, 4  ;;  %v752_v1 = vrot.slane %v750_v50, 5  ;;  %v3278_v6 = vld [vmem:[#allocation2 + $0x50] sm:$0xf]  ;;  %v738_v8 = vrot.slane %v737_v59, 4 }
  0x4f   : > { %2784 = vmatpush.bf16.msra.mxu2 %v3938_v55  ;;  %2735 = vmatpush.bf16.msra.mxu1 %v3930_v63  ;;  %v3944_v55 = vld [vmem:[%s4931_s1 + $0x1e8] sm:$0xff]  ;;  %v3272_v63 = vld [vmem:[#allocation2 + $0x6c] sm:$0xf0]  ;;  %v3825_v7 = vld [vmem:[#allocation2 + $0x70] sm:$0xf0]  ;;  %v341_v9 = vshll.u32 %v242_v61, 16 }
  0x50   : > { %2645 = vmatmul.bf16.vlgmr.msrb.gmra.mxu3 %v3247_v10  ;;  %2694 = vmatmul.bf16.vlgmr.msrb.gmra.mxu0 %v3251_v26  ;;  %v747_v0 = vor.u32 %v746_v54, %v742_v53  ;;  %v345_v10 = vshrl.u32 %v242_v61, 16  ;;  %v3821_v11 = vld [vmem:[#allocation2 + $0x54] sm:$0xf]  ;;  %v3280_v12 = vld [vmem:[#allocation2 + $0x74] sm:$0xf0]  ;;  %v334_v14 = vrot.slane %v332_v4, 4  ;;  %v743_v18 = vsel %vm4206_vm5, %v738_v8, %v742_v53 }
  0x51   : > { %2833 = vmatpush.bf16.msra.mxu3 %v3946_v16  ;;  %2882 = vmatpush.bf16.msra.mxu0 %v3954_v17  ;;  %v337_v15 = vrot.slane %v335_v5, 5  ;;  %v351_v16 = vshll.u32 %v243_v2, 16  ;;  %v3286_v17 = vld [vmem:[#allocation2 + $0x58] sm:$0xf]  ;;  %v343_v19 = vrot.slane %v341_v9, 5  ;;  %v3279_v31 = vor.u32 %v3825_v7, %v3278_v6  ;;  %v3943_v59 = vld [vmem:[%s4931_s1 + $0x1e0] sm:$0xff] }
  0x52   : > { %v748_v13 = vrot.slane %v747_v0, 4  ;;  %v347_v20 = vrot.slane %v345_v10, 4  ;;  %v492_v21 = vld [vmem:[%s4129_s30 + $0x24] sm:$0xe]  ;;  %894 = vst [vmem:[#allocation2 + $0xa0] sm:$0xf] %v743_v18 }
  0x53   : > { %2785 = vmatpush.bf16.msra.mxu2 %v3937_v22  ;;  %2736 = vmatpush.bf16.msra.mxu1 %v3929_v28  ;;  %v3826_v22 = vld [vmem:[#allocation2 + $0x78] sm:$0xf0]  ;;  %v338_v24 = vor.u32 %v337_v15, %v334_v14  ;;  %v353_v25 = vrot.slane %v351_v16, 5  ;;  %v3079_v26 = vrot.slane %v492_v21, 9  ;;  %v493_v29 = vld [vmem:[%s4129_s30 + $0x28] sm:$0xf] }
  0x54   : > { %v753_v23 = vsel %vm4206_vm5, %v748_v13, %v752_v1  ;;  %v348_v28 = vor.u32 %v347_v20, %v343_v19  ;;  %v494_v30 = vld [vmem:[%s4129_s30 + $0x2c] sm:$0x1]  ;;  %v557_v33 = vrot.slane %v493_v29, 5  ;;  %v3092_v35 = vld [vmem:[%s4129_s30 + $0x30] sm:$0xf]  ;;  %v3287_v37 = vor.u32 %v3826_v22, %v3286_v17  ;;  %v3927_v60 = vld [vmem:[%s4931_s1 + $0x160] sm:$0xff] }
  0x55   : > { %2834 = vmatpush.bf16.msra.mxu3 %v3945_v27  ;;  %2883 = vmatpush.bf16.msra.mxu0 %v3953_v36  ;;  %v3275_v27 = vor.u32 %v3820_v62, %v3272_v63  ;;  %895 = vst [vmem:[#allocation2 + $0xc4] sm:$0xf] %v753_v23  ;;  %v339_v32 = vrot.slane %v338_v24, 4  ;;  %v560_v34 = vrot.slane %v494_v30, 5  ;;  %v3283_v36 = vor.u32 %v3821_v11, %v3280_v12  ;;  %v3093_v39 = vld [vmem:[%s4129_s30 + $0x34] sm:$0xf] }
  0x56   : > { %v349_v38 = vrot.slane %v348_v28, 4  ;;  %648 = vst [vmem:[#allocation2 + $0xe4] sm:$0xf] %v3092_v35  ;;  %v558_v41 = vsel %vm4187_vm4, %v3079_v26, %v557_v33  ;;  %v559_v42 = vrot.slane %v557_v33, 4  ;;  %v3111_v43 = vld [vmem:[%s4129_s30 + $0x30] sm:$0xf] }
  0x57   : > { %2786 = vmatpush.bf16.msra.mxu2 %v3936_v48  ;;  %2737 = vmatpush.bf16.msra.mxu1 %v3928_v56  ;;  %v344_v40 = vsel %vm4206_vm5, %v339_v32, %v343_v19  ;;  %649 = vst [vmem:[#allocation2 + $0x108] sm:$0xf] %v3093_v39  ;;  %v3112_v45 = vld [vmem:[%s4129_s30 + $0x34] sm:$0xf]  ;;  %v3113_v46 = vld [vmem:[%s4129_s30 + $0x38] sm:$0x1] }
  0x58   : > { %v354_v44 = vsel %vm4206_vm5, %v349_v38, %v353_v25  ;;  %473 = vst [vmem:[#allocation2 + $0xdc] sm:$0xf] %v344_v40  ;;  %v561_v47 = vsel %vm4187_vm4, %v559_v42, %v560_v34  ;;  %v755_v48 = vshrl.u32 %v3111_v43, 16  ;;  %v758_v49 = vshll.u32 %v3111_v43, 16  ;;  %v3951_v61 = vld [vmem:[%s4931_s1 + $0x220] sm:$0xff] }
  0x59   : > { %2835 = vmatpush.bf16.msra.mxu3 %v3944_v55  ;;  %2884 = vmatpush.bf16.msra.mxu0 %v3952_v58  ;;  %474 = vst [vmem:[#allocation2 + $0x100] sm:$0xf] %v354_v44  ;;  %v764_v50 = vshll.u32 %v3112_v45, 16  ;;  %v768_v52 = vshrl.u32 %v3112_v45, 16  ;;  %v774_v58 = vshll.u32 %v3113_v46, 16 }
  0x5a   : > { %612 = vst [vmem:[#allocation2 + $0xe0] sm:$0xf] %v558_v41  ;;  %v757_v53 = vrot.slane %v755_v48, 4  ;;  %v760_v54 = vrot.slane %v758_v49, 5  ;;  %v244_v63 = vld [vmem:[%s4129_s30 + $0x30] sm:$0xf] }
  0x5b   : > { %613 = vst [vmem:[#allocation2 + $0x104] sm:$0xf] %v561_v47  ;;  %2787 = vmatpush.bf16.msra.mxu2 %v3935_v51  ;;  %v766_v55 = vrot.slane %v764_v50, 5  ;;  %v770_v56 = vrot.slane %v768_v52, 4  ;;  %v245_v0 = vld [vmem:[%s4129_s30 + $0x34] sm:$0xf]  ;;  %2738 = vmatpush.bf16.msra.mxu1 %v3927_v60 }
  0x5c   : > { %v761_v62 = vor.u32 %v760_v54, %v757_v53  ;;  %v776_v2 = vrot.slane %v774_v58, 5  ;;  %v246_v4 = vld [vmem:[%s4129_s30 + $0x38] sm:$0x1]  ;;  %v356_v5 = vshrl.u32 %v244_v63, 16  ;;  %v359_v7 = vshll.u32 %v244_v63, 16 }
  0x5d   : > { %v771_v1 = vor.u32 %v770_v56, %v766_v55  ;;  %2836 = vmatpush.bf16.msra.mxu3 %v3943_v59  ;;  %2885 = vmatpush.bf16.msra.mxu0 %v3951_v61  ;;  %v365_v8 = vshll.u32 %v245_v0, 16  ;;  %v3829_v9 = vld [vmem:[#allocation2 + $0x94] sm:$0xf]  ;;  %v3308_v10 = vld [vmem:[#allocation2 + $0xb4] sm:$0xf0]  ;;  %v369_v17 = vshrl.u32 %v245_v0, 16 }
  0x5e   : > { %2552 = vmatmul.bf16.gmra.mxu1 %v3275_v27  ;;  %2601 = vmatmul.bf16.gmra.mxu2 %v3279_v31  ;;  %v762_v6 = vrot.slane %v761_v62, 4  ;;  %v3314_v11 = vld [vmem:[#allocation2 + $0x98] sm:$0xf]  ;;  %v3834_v12 = vld [vmem:[#allocation2 + $0xb8] sm:$0xf0]  ;;  %v358_v16 = vrot.slane %v356_v5, 4 }
  0x5f   : > { %v3830_v13 = vld [vmem:[#allocation2 + $0x9c] sm:$0xf]  ;;  %v3316_v14 = vld [vmem:[#allocation2 + $0xbc] sm:$0xf0]  ;;  %v772_v15 = vrot.slane %v771_v1, 4  ;;  %v375_v18 = vshll.u32 %v246_v4, 16 }
  0x60   : > { %2650 = vmatmul.bf16.gmra.mxu3 %v3283_v36  ;;  %2699 = vmatmul.bf16.gmra.mxu0 %v3287_v37  ;;  %v3322_v19 = vld [vmem:[#allocation2 + $0xa0] sm:$0xf]  ;;  %v767_v20 = vsel %vm4206_vm5, %v762_v6, %v766_v55  ;;  %v361_v21 = vrot.slane %v359_v7, 5  ;;  %v367_v22 = vrot.slane %v365_v8, 5  ;;  %v495_v23 = vld [vmem:[%s4129_s30 + $0x30] sm:$0xe]  ;;  %v3311_v36 = vor.u32 %v3829_v9, %v3308_v10 }
  0x61   : > { %v3835_v24 = vld [vmem:[#allocation2 + $0xc0] sm:$0xf0]  ;;  %v777_v25 = vsel %vm4206_vm5, %v772_v15, %v776_v2  ;;  %896 = vst [vmem:[#allocation2 + $0xe8] sm:$0xf] %v767_v20  ;;  %v371_v26 = vrot.slane %v369_v17, 4  ;;  %v377_v27 = vrot.slane %v375_v18, 5  ;;  %v3315_v37 = vor.u32 %v3834_v12, %v3314_v11 }
  0x62   : > { %897 = vst [vmem:[#allocation2 + $0x10c] sm:$0xf] %v777_v25  ;;  %v362_v28 = vor.u32 %v361_v21, %v358_v16  ;;  %v496_v29 = vld [vmem:[%s4129_s30 + $0x34] sm:$0xf]  ;;  %v497_v30 = vld [vmem:[%s4129_s30 + $0x38] sm:$0x1]  ;;  %v3319_v38 = vor.u32 %v3830_v13, %v3316_v14  ;;  %v3323_v41 = vor.u32 %v3835_v24, %v3322_v19 }
  0x63   : > { %v372_v31 = vor.u32 %v371_v26, %v367_v22  ;;  %v3080_v32 = vrot.slane %v495_v23, 9  ;;  %v564_v33 = vrot.slane %v496_v29, 5  ;;  %v567_v34 = vrot.slane %v497_v30, 5  ;;  %v3094_v35 = vld [vmem:[%s4129_s30 + $0x3c] sm:$0xf] }
  0x64   : > { %v363_v39 = vrot.slane %v362_v28, 4  ;;  %v3095_v40 = vld [vmem:[%s4129_s30 + $0x40] sm:$0xf]  ;;  %650 = vst [vmem:[#allocation2 + $0x12c] sm:$0xf] %v3094_v35  ;;  %v3934_v56 = vld [vmem:[%s4931_s1 + $0x198] sm:$0xff] }
  0x65   : > { %v373_v42 = vrot.slane %v372_v31, 4  ;;  %v565_v43 = vsel %vm4187_vm4, %v3080_v32, %v564_v33  ;;  %v566_v44 = vrot.slane %v564_v33, 4  ;;  %651 = vst [vmem:[#allocation2 + $0x150] sm:$0xf] %v3095_v40  ;;  %v3114_v45 = vld [vmem:[%s4129_s30 + $0x3c] sm:$0xf]  ;;  %2788 = vmatpush.bf16.msra.mxu2 %v3934_v56 }
  0x66   : > { %v368_v46 = vsel %vm4206_vm5, %v363_v39, %v367_v22  ;;  %614 = vst [vmem:[#allocation2 + $0x128] sm:$0xf] %v565_v43  ;;  %v3115_v47 = vld [vmem:[%s4129_s30 + $0x40] sm:$0xf]  ;;  %v3116_v50 = vld [vmem:[%s4129_s30 + $0x44] sm:$0x1] }
  0x67   : > { %v378_v48 = vsel %vm4206_vm5, %v373_v42, %v377_v27  ;;  %475 = vst [vmem:[#allocation2 + $0x124] sm:$0xf] %v368_v46  ;;  %v568_v49 = vsel %vm4187_vm4, %v566_v44, %v567_v34  ;;  %v779_v51 = vshrl.u32 %v3114_v45, 16  ;;  %v782_v52 = vshll.u32 %v3114_v45, 16  ;;  %v247_v55 = vld [vmem:[%s4129_s30 + $0x3c] sm:$0xf] }
  0x68   : > { %476 = vst [vmem:[#allocation2 + $0x148] sm:$0xf] %v378_v48  ;;  %v788_v53 = vshll.u32 %v3115_v47, 16  ;;  %v792_v54 = vshrl.u32 %v3115_v47, 16  ;;  %v3942_v62 = vld [vmem:[%s4931_s1 + $0x1d8] sm:$0xff]  ;;  %v798_v1 = vshll.u32 %v3116_v50, 16 }
  0x69   : > { %615 = vst [vmem:[#allocation2 + $0x14c] sm:$0xf] %v568_v49  ;;  %v781_v58 = vrot.slane %v779_v51, 4  ;;  %v784_v59 = vrot.slane %v782_v52, 5  ;;  %v3926_v63 = vld [vmem:[%s4931_s1 + $0x158] sm:$0xff]  ;;  %v380_v4 = vshrl.u32 %v247_v55, 16  ;;  %2837 = vmatpush.bf16.msra.mxu3 %v3942_v62 }
  0x6a   : > { %v790_v60 = vrot.slane %v788_v53, 5  ;;  %v794_v61 = vrot.slane %v792_v54, 4  ;;  %v3950_v0 = vld [vmem:[%s4931_s1 + $0x218] sm:$0xff]  ;;  %v248_v2 = vld [vmem:[%s4129_s30 + $0x40] sm:$0xf]  ;;  %2739 = vmatpush.bf16.msra.mxu1 %v3926_v63  ;;  %v383_v8 = vshll.u32 %v247_v55, 16 }
  0x6b   : > { %v785_v5 = vor.u32 %v784_v59, %v781_v58  ;;  %v249_v7 = vld [vmem:[%s4129_s30 + $0x44] sm:$0x1]  ;;  %v389_v9 = vshll.u32 %v248_v2, 16  ;;  %v800_v10 = vrot.slane %v798_v1, 5  ;;  %2886 = vmatpush.bf16.msra.mxu0 %v3950_v0  ;;  %v382_v11 = vrot.slane %v380_v4, 4  ;;  %v3933_v63 = vld [vmem:[%s4931_s1 + $0x190] sm:$0xff] }
  0x6c   : > { %v795_v6 = vor.u32 %v794_v61, %v790_v60  ;;  %v393_v12 = vshrl.u32 %v248_v2, 16  ;;  %v3838_v13 = vld [vmem:[#allocation2 + $0xdc] sm:$0xf]  ;;  %v3344_v14 = vld [vmem:[#allocation2 + $0xfc] sm:$0xf0]  ;;  %v385_v17 = vrot.slane %v383_v8, 5  ;;  %2789 = vmatpush.bf16.msra.mxu2 %v3933_v63 }
  0x6d   : > { %v786_v15 = vrot.slane %v785_v5, 4  ;;  %v391_v18 = vrot.slane %v389_v9, 5  ;;  %v3350_v19 = vld [vmem:[#allocation2 + $0xe0] sm:$0xf]  ;;  %v3843_v20 = vld [vmem:[#allocation2 + $0x100] sm:$0xf0]  ;;  %v3347_v40 = vor.u32 %v3838_v13, %v3344_v14 }
  0x6e   : > { %2557 = vmatmul.bf16.gmra.mxu1 %v3311_v36  ;;  %2606 = vmatmul.bf16.gmra.mxu2 %v3315_v37  ;;  %v796_v16 = vrot.slane %v795_v6, 4  ;;  %v395_v21 = vrot.slane %v393_v12, 4  ;;  %v399_v22 = vshll.u32 %v249_v7, 16  ;;  %v498_v23 = vld [vmem:[%s4129_s30 + $0x3c] sm:$0xe]  ;;  %v386_v30 = vor.u32 %v385_v17, %v382_v11  ;;  %v3941_v4 = vld [vmem:[%s4931_s1 + $0x1d0] sm:$0xff] }
  0x6f   : > { %v3839_v24 = vld [vmem:[#allocation2 + $0xe4] sm:$0xf]  ;;  %v3352_v25 = vld [vmem:[#allocation2 + $0x104] sm:$0xf0]  ;;  %v3844_v27 = vld [vmem:[#allocation2 + $0x108] sm:$0xf0]  ;;  %v791_v28 = vsel %vm4206_vm5, %v786_v15, %v790_v60  ;;  %v3351_v43 = vor.u32 %v3843_v20, %v3350_v19  ;;  %2838 = vmatpush.bf16.msra.mxu3 %v3941_v4 }
  0x70   : > { %2655 = vmatmul.bf16.gmra.mxu3 %v3319_v38  ;;  %2704 = vmatmul.bf16.gmra.mxu0 %v3323_v41  ;;  %v3358_v26 = vld [vmem:[#allocation2 + $0xe8] sm:$0xf]  ;;  %v801_v29 = vsel %vm4206_vm5, %v796_v16, %v800_v10  ;;  %v499_v31 = vld [vmem:[%s4129_s30 + $0x40] sm:$0xf]  ;;  %v500_v32 = vld [vmem:[%s4129_s30 + $0x44] sm:$0x1]  ;;  %v396_v33 = vor.u32 %v395_v21, %v391_v18  ;;  %v3355_v48 = vor.u32 %v3839_v24, %v3352_v25 }
  0x71   : > { %898 = vst [vmem:[#allocation2 + $0x130] sm:$0xf] %v791_v28  ;;  %v401_v34 = vrot.slane %v399_v22, 5  ;;  %v3081_v35 = vrot.slane %v498_v23, 9  ;;  %v3096_v36 = vld [vmem:[%s4129_s30 + $0x48] sm:$0xf]  ;;  %v3359_v49 = vor.u32 %v3844_v27, %v3358_v26 }
  0x72   : > { %899 = vst [vmem:[#allocation2 + $0x154] sm:$0xf] %v801_v29  ;;  %v387_v37 = vrot.slane %v386_v30, 4  ;;  %v571_v38 = vrot.slane %v499_v31, 5  ;;  %v574_v39 = vrot.slane %v500_v32, 5  ;;  %v397_v41 = vrot.slane %v396_v33, 4 }
  0x73   : > { %v3097_v42 = vld [vmem:[%s4129_s30 + $0x4c] sm:$0xf]  ;;  %652 = vst [vmem:[#allocation2 + $0x174] sm:$0xf] %v3096_v36  ;;  %v3117_v47 = vld [vmem:[%s4129_s30 + $0x48] sm:$0xf] }
  0x74   : > { %v392_v44 = vsel %vm4206_vm5, %v387_v37, %v391_v18  ;;  %v572_v45 = vsel %vm4187_vm4, %v3081_v35, %v571_v38  ;;  %v573_v46 = vrot.slane %v571_v38, 4  ;;  %653 = vst [vmem:[#allocation2 + $0x198] sm:$0xf] %v3097_v42  ;;  %v402_v50 = vsel %vm4206_vm5, %v397_v41, %v401_v34  ;;  %v3118_v51 = vld [vmem:[%s4129_s30 + $0x4c] sm:$0xf]  ;;  %v3925_v5 = vld [vmem:[%s4931_s1 + $0x150] sm:$0xff] }
  0x75   : > { %477 = vst [vmem:[#allocation2 + $0x16c] sm:$0xf] %v392_v44  ;;  %v3119_v52 = vld [vmem:[%s4129_s30 + $0x50] sm:$0x1]  ;;  %v803_v54 = vshrl.u32 %v3117_v47, 16  ;;  %v806_v55 = vshll.u32 %v3117_v47, 16  ;;  %2740 = vmatpush.bf16.msra.mxu1 %v3925_v5 }
  0x76   : > { %478 = vst [vmem:[#allocation2 + $0x190] sm:$0xf] %v402_v50  ;;  %v575_v53 = vsel %vm4187_vm4, %v573_v46, %v574_v39  ;;  %v812_v56 = vshll.u32 %v3118_v51, 16  ;;  %v816_v58 = vshrl.u32 %v3118_v51, 16  ;;  %v822_v59 = vshll.u32 %v3119_v52, 16  ;;  %v3949_v10 = vld [vmem:[%s4931_s1 + $0x210] sm:$0xff] }
  0x77   : > { %616 = vst [vmem:[#allocation2 + $0x170] sm:$0xf] %v572_v45  ;;  %v250_v60 = vld [vmem:[%s4129_s30 + $0x48] sm:$0xf]  ;;  %v805_v61 = vrot.slane %v803_v54, 4  ;;  %v808_v62 = vrot.slane %v806_v55, 5  ;;  %2887 = vmatpush.bf16.msra.mxu0 %v3949_v10 }
  0x78   : > { %617 = vst [vmem:[#allocation2 + $0x194] sm:$0xf] %v575_v53  ;;  %v814_v0 = vrot.slane %v812_v56, 5  ;;  %v818_v1 = vrot.slane %v816_v58, 4  ;;  %v404_v6 = vshrl.u32 %v250_v60, 16  ;;  %v407_v7 = vshll.u32 %v250_v60, 16 }
  0x79   : > { %v809_v2 = vor.u32 %v808_v62, %v805_v61  ;;  %v824_v9 = vrot.slane %v822_v59, 5  ;;  %v251_v12 = vld [vmem:[%s4129_s30 + $0x4c] sm:$0xf]  ;;  %v252_v15 = vld [vmem:[%s4129_s30 + $0x50] sm:$0x1] }
  0x7a   : > { %v819_v8 = vor.u32 %v818_v1, %v814_v0  ;;  %v406_v13 = vrot.slane %v404_v6, 4  ;;  %v409_v16 = vrot.slane %v407_v7, 5  ;;  %v3848_v17 = vld [vmem:[#allocation2 + $0x12c] sm:$0xf]  ;;  %v3388_v18 = vld [vmem:[#allocation2 + $0x14c] sm:$0xf0] }
  0x7b   : > { %v810_v11 = vrot.slane %v809_v2, 4  ;;  %v413_v20 = vshll.u32 %v251_v12, 16  ;;  %v417_v21 = vshrl.u32 %v251_v12, 16  ;;  %v501_v22 = vld [vmem:[%s4129_s30 + $0x48] sm:$0xe]  ;;  %v423_v29 = vshll.u32 %v252_v15, 16 }
  0x7c   : > { %v820_v14 = vrot.slane %v819_v8, 4  ;;  %v3847_v23 = vld [vmem:[#allocation2 + $0x124] sm:$0xf]  ;;  %v3380_v24 = vld [vmem:[#allocation2 + $0x144] sm:$0xf0]  ;;  %v410_v28 = vor.u32 %v409_v16, %v406_v13  ;;  %v3082_v30 = vrot.slane %v501_v22, 9 }
  0x7d   : > { %v815_v19 = vsel %vm4206_vm5, %v810_v11, %v814_v0  ;;  %v3386_v25 = vld [vmem:[#allocation2 + $0x128] sm:$0xf]  ;;  %v3852_v26 = vld [vmem:[#allocation2 + $0x148] sm:$0xf0]  ;;  %v415_v31 = vrot.slane %v413_v20, 5  ;;  %v419_v32 = vrot.slane %v417_v21, 4 }
  0x7e   : > { %2562 = vmatmul.bf16.gmra.mxu1 %v3347_v40  ;;  %2611 = vmatmul.bf16.gmra.mxu2 %v3351_v43  ;;  %v825_v27 = vsel %vm4206_vm5, %v820_v14, %v824_v9  ;;  %900 = vst [vmem:[#allocation2 + $0x178] sm:$0xf] %v815_v19  ;;  %v502_v33 = vld [vmem:[%s4129_s30 + $0x4c] sm:$0xf]  ;;  %v3394_v34 = vld [vmem:[#allocation2 + $0x130] sm:$0xf]  ;;  %v3391_v43 = vor.u32 %v3848_v17, %v3388_v18 }
  0x7f   : > { %901 = vst [vmem:[#allocation2 + $0x19c] sm:$0xf] %v825_v27  ;;  %v411_v35 = vrot.slane %v410_v28, 4  ;;  %v503_v36 = vld [vmem:[%s4129_s30 + $0x50] sm:$0x1]  ;;  %v578_v37 = vrot.slane %v502_v33, 5  ;;  %v420_v39 = vor.u32 %v419_v32, %v415_v31  ;;  %v3387_v50 = vor.u32 %v3852_v26, %v3386_v25 }
  0x80   : > { %2660 = vmatmul.bf16.gmra.mxu3 %v3355_v48  ;;  %2709 = vmatmul.bf16.gmra.mxu0 %v3359_v49  ;;  %v3853_v38 = vld [vmem:[#allocation2 + $0x150] sm:$0xf0]  ;;  %v425_v40 = vrot.slane %v423_v29, 5  ;;  %v581_v41 = vrot.slane %v503_v36, 5  ;;  %v3099_v47 = vld [vmem:[%s4129_s30 + $0x58] sm:$0xf]  ;;  %v3383_v49 = vor.u32 %v3847_v23, %v3380_v24 }
  0x81   : > { %v3098_v42 = vld [vmem:[%s4129_s30 + $0x54] sm:$0xf]  ;;  %v416_v44 = vsel %vm4206_vm5, %v411_v35, %v415_v31  ;;  %v579_v45 = vsel %vm4187_vm4, %v3082_v30, %v578_v37  ;;  %v580_v46 = vrot.slane %v578_v37, 4  ;;  %v421_v51 = vrot.slane %v420_v39, 4  ;;  %v3121_v52 = vld [vmem:[%s4129_s30 + $0x58] sm:$0xf] }
  0x82   : > { %654 = vst [vmem:[#allocation2 + $0x1bc] sm:$0xf] %v3098_v42  ;;  %v3120_v48 = vld [vmem:[%s4129_s30 + $0x54] sm:$0xf]  ;;  %v3395_v54 = vor.u32 %v3853_v38, %v3394_v34  ;;  %v3122_v56 = vld [vmem:[%s4129_s30 + $0x5c] sm:$0x1] }
  0x83   : > { %479 = vst [vmem:[#allocation2 + $0x1b4] sm:$0xf] %v416_v44  ;;  %v827_v53 = vshrl.u32 %v3120_v48, 16  ;;  %v582_v55 = vsel %vm4187_vm4, %v580_v46, %v581_v41  ;;  %v830_v58 = vshll.u32 %v3120_v48, 16  ;;  %v836_v59 = vshll.u32 %v3121_v52, 16  ;;  %v3932_v5 = vld [vmem:[%s4931_s1 + $0x188] sm:$0xff] }
  0x84   : > { %618 = vst [vmem:[#allocation2 + $0x1b8] sm:$0xf] %v579_v45  ;;  %v426_v60 = vsel %vm4206_vm5, %v421_v51, %v425_v40  ;;  %v840_v62 = vshrl.u32 %v3121_v52, 16  ;;  %v846_v2 = vshll.u32 %v3122_v56, 16  ;;  %v253_v4 = vld [vmem:[%s4129_s30 + $0x54] sm:$0xf]  ;;  %2790 = vmatpush.bf16.msra.mxu2 %v3932_v5 }
  0x85   : > { %619 = vst [vmem:[#allocation2 + $0x1dc] sm:$0xf] %v582_v55  ;;  %v829_v61 = vrot.slane %v827_v53, 4  ;;  %v832_v63 = vrot.slane %v830_v58, 5  ;;  %v838_v0 = vrot.slane %v836_v59, 5  ;;  %v3940_v7 = vld [vmem:[%s4931_s1 + $0x1c8] sm:$0xff] }
  0x86   : > { %480 = vst [vmem:[#allocation2 + $0x1d8] sm:$0xf] %v426_v60  ;;  %v842_v1 = vrot.slane %v840_v62, 4  ;;  %v254_v8 = vld [vmem:[%s4129_s30 + $0x58] sm:$0xf]  ;;  %v428_v9 = vshrl.u32 %v253_v4, 16  ;;  %2839 = vmatpush.bf16.msra.mxu3 %v3940_v7 }
  0x87   : > { %655 = vst [vmem:[#allocation2 + $0x1e0] sm:$0xf] %v3099_v47  ;;  %v833_v6 = vor.u32 %v832_v63, %v829_v61  ;;  %v431_v10 = vshll.u32 %v253_v4, 16  ;;  %v848_v12 = vrot.slane %v846_v2, 5  ;;  %v255_v13 = vld [vmem:[%s4129_s30 + $0x5c] sm:$0x1] }
  0x88   : > { %v843_v11 = vor.u32 %v842_v1, %v838_v0  ;;  %v437_v14 = vshll.u32 %v254_v8, 16  ;;  %v430_v16 = vrot.slane %v428_v9, 4  ;;  %v441_v18 = vshrl.u32 %v254_v8, 16  ;;  %v4543_v22 = vld [vmem:[#allocation2 + $0x174] sm:$0xf]  ;;  %v3924_v25 = vld [vmem:[%s4931_s1 + $0x148] sm:$0xff] }
  0x89   : > { %v834_v15 = vrot.slane %v833_v6, 4  ;;  %v433_v17 = vrot.slane %v431_v10, 5  ;;  %v447_v21 = vshll.u32 %v255_v13, 16  ;;  %v4545_v23 = vld [vmem:[#allocation2 + $0x194] sm:$0xf0]  ;;  %2741 = vmatpush.bf16.msra.mxu1 %v3924_v25  ;;  %v3948_v34 = vld [vmem:[%s4931_s1 + $0x208] sm:$0xff] }
  0x8a   : > { %v844_v19 = vrot.slane %v843_v11, 4  ;;  %v439_v20 = vrot.slane %v437_v14, 5  ;;  %v443_v27 = vrot.slane %v441_v18, 4  ;;  %v504_v28 = vld [vmem:[%s4129_s30 + $0x54] sm:$0xe]  ;;  %2888 = vmatpush.bf16.msra.mxu0 %v3948_v34 }
  0x8b   : > { %v839_v24 = vsel %vm4206_vm5, %v834_v15, %v838_v0  ;;  %v434_v26 = vor.u32 %v433_v17, %v430_v16  ;;  %v3856_v29 = vld [vmem:[#allocation2 + $0x16c] sm:$0xf]  ;;  %v3416_v30 = vld [vmem:[#allocation2 + $0x18c] sm:$0xf0]  ;;  %v3861_v33 = vld [vmem:[#allocation2 + $0x190] sm:$0xf0] }
  0x8c   : > { %v849_v31 = vsel %vm4206_vm5, %v844_v19, %v848_v12  ;;  %902 = vst [vmem:[#allocation2 + $0x1c0] sm:$0xf] %v839_v24  ;;  %v3422_v32 = vld [vmem:[#allocation2 + $0x170] sm:$0xf]  ;;  %v444_v36 = vor.u32 %v443_v27, %v439_v20  ;;  %v449_v37 = vrot.slane %v447_v21, 5  ;;  %v3083_v38 = vrot.slane %v504_v28, 9 }
  0x8d   : > { %903 = vst [vmem:[#allocation2 + $0x1e4] sm:$0xf] %v849_v31  ;;  %v435_v35 = vrot.slane %v434_v26, 4  ;;  %v3430_v39 = vld [vmem:[#allocation2 + $0x178] sm:$0xf]  ;;  %v3419_v48 = vor.u32 %v3856_v29, %v3416_v30  ;;  %v3423_v59 = vor.u32 %v3861_v33, %v3422_v32  ;;  %v3931_v12 = vld [vmem:[%s4931_s1 + $0x180] sm:$0xff] }
  0x8e   : > { %2567 = vmatmul.bf16.gmra.mxu1 %v3383_v49  ;;  %2616 = vmatmul.bf16.gmra.mxu2 %v3387_v50  ;;  %v505_v40 = vld [vmem:[%s4129_s30 + $0x58] sm:$0xf]  ;;  %v506_v41 = vld [vmem:[%s4129_s30 + $0x5c] sm:$0x1]  ;;  %v3100_v42 = vld [vmem:[%s4129_s30 + $0x60] sm:$0xf]  ;;  %v3427_v49 = vor.u32 %v4543_v22, %v4545_v23 }
  0x8f   : > { %v440_v44 = vsel %vm4206_vm5, %v435_v35, %v439_v20  ;;  %v445_v45 = vrot.slane %v444_v36, 4  ;;  %v585_v46 = vrot.slane %v505_v40, 5  ;;  %v588_v47 = vrot.slane %v506_v41, 5  ;;  %v3101_v50 = vld [vmem:[%s4129_s30 + $0x64] sm:$0xf]  ;;  %2791 = vmatpush.bf16.msra.mxu2 %v3931_v12 }
  0x90   : > { %2665 = vmatmul.bf16.gmra.mxu3 %v3391_v43  ;;  %2714 = vmatmul.bf16.gmra.mxu0 %v3395_v54  ;;  %v3862_v43 = vld [vmem:[#allocation2 + $0x198] sm:$0xf0]  ;;  %481 = vst [vmem:[#allocation2 + $0x1fc] sm:$0xf] %v440_v44  ;;  %v3123_v51 = vld [vmem:[%s4129_s30 + $0x60] sm:$0xf] }
  0x91   : > { %v3124_v52 = vld [vmem:[%s4129_s30 + $0x64] sm:$0xf]  ;;  %v450_v53 = vsel %vm4206_vm5, %v445_v45, %v449_v37  ;;  %v586_v54 = vsel %vm4187_vm4, %v3083_v38, %v585_v46  ;;  %v587_v55 = vrot.slane %v585_v46, 4  ;;  %656 = vst [vmem:[#allocation2 + $0x204] sm:$0xf] %v3100_v42  ;;  %v851_v58 = vshrl.u32 %v3123_v51, 16 }
  0x92   : > { %v3125_v56 = vld [vmem:[%s4129_s30 + $0x68] sm:$0x1]  ;;  %482 = vst [vmem:[#allocation2 + $0x220] sm:$0xf] %v450_v53  ;;  %v854_v60 = vshll.u32 %v3123_v51, 16  ;;  %v860_v61 = vshll.u32 %v3124_v52, 16  ;;  %v3431_v63 = vor.u32 %v3862_v43, %v3430_v39 }
  0x93   : > { %v864_v62 = vshrl.u32 %v3124_v52, 16  ;;  %v589_v0 = vsel %vm4187_vm4, %v587_v55, %v588_v47  ;;  %620 = vst [vmem:[#allocation2 + $0x200] sm:$0xf] %v586_v54  ;;  %v853_v1 = vrot.slane %v851_v58, 4  ;;  %v870_v2 = vshll.u32 %v3125_v56, 16  ;;  %v3939_v15 = vld [vmem:[%s4931_s1 + $0x1c0] sm:$0xff] }
  0x94   : > { %621 = vst [vmem:[#allocation2 + $0x224] sm:$0xf] %v589_v0  ;;  %v856_v4 = vrot.slane %v854_v60, 5  ;;  %v862_v5 = vrot.slane %v860_v61, 5  ;;  %v3176_v7 = vld [vmem:[%s4129_s30 + $0x18] sm:$0xf]  ;;  %2840 = vmatpush.bf16.msra.mxu3 %v3939_v15 }
  0x95   : > { %657 = vst [vmem:[#allocation2 + $0x228] sm:$0xf] %v3101_v50  ;;  %v866_v6 = vrot.slane %v864_v62, 4  ;;  %v3177_v9 = vld [vmem:[%s4129_s30 + $0x1c] sm:$0xf]  ;;  %v1103_v10 = vshrl.u32 %v3176_v7, 16 }
  0x96   : > { %v857_v8 = vor.u32 %v856_v4, %v853_v1  ;;  %v1106_v11 = vshll.u32 %v3176_v7, 16  ;;  %v872_v14 = vrot.slane %v870_v2, 5  ;;  %v3127_v17 = vld [vmem:[%s4129_s30 + $0x10] sm:$0xf]  ;;  %v3126_v20 = vld [vmem:[%s4129_s30 + $0xc] sm:$0xe] }
  0x97   : > { %v867_v13 = vor.u32 %v866_v6, %v862_v5  ;;  %v1105_v18 = vrot.slane %v1103_v10, 4  ;;  %v956_v21 = vrot.slane %v3127_v17, 5  ;;  %v1112_v22 = vshll.u32 %v3177_v9, 16  ;;  %v3128_v24 = vld [vmem:[%s4129_s30 + $0x14] sm:$0x1]  ;;  %v3923_v28 = vld [vmem:[%s4931_s1 + $0x140] sm:$0xff] }
  0x98   : > { %v858_v16 = vrot.slane %v857_v8, 4  ;;  %v3150_v25 = vrot.slane %v3126_v20, 9  ;;  %v1108_v26 = vrot.slane %v1106_v11, 5  ;;  %v1116_v30 = vshrl.u32 %v3177_v9, 16  ;;  %v3865_v34 = vld [vmem:[#allocation2 + $0x1b4] sm:$0xf]  ;;  %2742 = vmatpush.bf16.msra.mxu1 %v3923_v28 }
  0x99   : > { %v868_v19 = vrot.slane %v867_v13, 4  ;;  %v958_v29 = vrot.slane %v956_v21, 4  ;;  %v959_v32 = vrot.slane %v3128_v24, 5  ;;  %v3452_v35 = vld [vmem:[#allocation2 + $0x1d4] sm:$0xf0]  ;;  %v3947_v38 = vld [vmem:[%s4931_s1 + $0x200] sm:$0xff] }
  0x9a   : > { %v863_v23 = vsel %vm4206_vm5, %v858_v16, %v862_v5  ;;  %v957_v31 = vsel %vm4187_vm4, %v3150_v25, %v956_v21  ;;  %v1109_v33 = vor.u32 %v1108_v26, %v1105_v18  ;;  %v3458_v36 = vld [vmem:[#allocation2 + $0x1b8] sm:$0xf]  ;;  %v3870_v37 = vld [vmem:[#allocation2 + $0x1d8] sm:$0xf0]  ;;  %v1114_v40 = vrot.slane %v1112_v22, 5  ;;  %2889 = vmatpush.bf16.msra.mxu0 %v3947_v38 }
  0x9b   : > { %v873_v27 = vsel %vm4206_vm5, %v868_v19, %v872_v14  ;;  %904 = vst [vmem:[#allocation2 + $0x208] sm:$0xf] %v863_v23  ;;  %v3160_v39 = vld [vmem:[%s4129_s30 + $0x18] sm:$0xf]  ;;  %v3866_v41 = vld [vmem:[#allocation2 + $0x1bc] sm:$0xf]  ;;  %v960_v45 = vsel %vm4187_vm4, %v958_v29, %v959_v32  ;;  %v3459_v60 = vor.u32 %v3870_v37, %v3458_v36 }
  0x9c   : > { %905 = vst [vmem:[#allocation2 + $0x22c] sm:$0xf] %v873_v27  ;;  %v3460_v42 = vld [vmem:[#allocation2 + $0x1dc] sm:$0xf0]  ;;  %v3871_v44 = vld [vmem:[#allocation2 + $0x1e0] sm:$0xf0] }
  0x9d   : > { %1026 = vst [vmem:[#allocation2 + $0x14] sm:$0xf] %v957_v31  ;;  %v3466_v43 = vld [vmem:[#allocation2 + $0x1c0] sm:$0xf]  ;;  %v3161_v46 = vld [vmem:[%s4129_s30 + $0x1c] sm:$0xf]  ;;  %v3463_v0 = vor.u32 %v3866_v41, %v3460_v42 }
  0x9e   : > { %2572 = vmatmul.bf16.gmra.mxu1 %v3419_v48  ;;  %2621 = vmatmul.bf16.gmra.mxu2 %v3423_v59  ;;  %1062 = vst [vmem:[#allocation2 + $0x18] sm:$0xf] %v3160_v39  ;;  %v3178_v47 = vld [vmem:[%s4129_s30 + $0x20] sm:$0x1]  ;;  %v1110_v48 = vrot.slane %v1109_v33, 4  ;;  %v3455_v59 = vor.u32 %v3865_v34, %v3452_v35  ;;  %v3467_v1 = vor.u32 %v3871_v44, %v3466_v43 }
  0x9f   : > { %1027 = vst [vmem:[#allocation2 + $0x38] sm:$0xf] %v960_v45  ;;  %v1122_v50 = vshll.u32 %v3178_v47, 16  ;;  %v3200_v51 = vld [vmem:[%s4129_s30 + $0x18] sm:$0xe] }
  0xa0   : > { %2670 = vmatmul.bf16.gmra.mxu3 %v3427_v49  ;;  %2719 = vmatmul.bf16.gmra.mxu0 %v3431_v63  ;;  %v1118_v49 = vrot.slane %v1116_v30, 4  ;;  %1063 = vst [vmem:[#allocation2 + $0x3c] sm:$0xf] %v3161_v46  ;;  %v3201_v52 = vld [vmem:[%s4129_s30 + $0x1c] sm:$0xf]  ;;  %v1115_v53 = vsel %vm4206_vm5, %v1110_v48, %v1114_v40  ;;  %v3224_v58 = vrot.slane %v3200_v51, 9 }
  0xa1   : > { %v1124_v55 = vrot.slane %v1122_v50, 5  ;;  %v3202_v56 = vld [vmem:[%s4129_s30 + $0x20] sm:$0x1]  ;;  %1310 = vst [vmem:[#allocation2 + $0x1c] sm:$0xf] %v1115_v53  ;;  %v1376_v61 = vrot.slane %v3201_v52, 5 }
  0xa2   : > { %v1119_v54 = vor.u32 %v1118_v49, %v1114_v40  ;;  %v1379_v62 = vrot.slane %v3202_v56, 5  ;;  %v3179_v4 = vld [vmem:[%s4129_s30 + $0x24] sm:$0xf]  ;;  %v3180_v8 = vld [vmem:[%s4129_s30 + $0x28] sm:$0xf] }
  0xa3   : > { %v1377_v6 = vsel %vm4187_vm4, %v3224_v58, %v1376_v61  ;;  %v1378_v7 = vrot.slane %v1376_v61, 4  ;;  %v1127_v10 = vshrl.u32 %v3179_v4, 16  ;;  %v1130_v11 = vshll.u32 %v3179_v4, 16  ;;  %v3130_v13 = vld [vmem:[%s4129_s30 + $0x1c] sm:$0xf] }
  0xa4   : > { %v1120_v2 = vrot.slane %v1119_v54, 4  ;;  %1446 = vst [vmem:[#allocation2 + $0x20] sm:$0xf] %v1377_v6  ;;  %v1136_v14 = vshll.u32 %v3180_v8, 16  ;;  %v1140_v15 = vshrl.u32 %v3180_v8, 16  ;;  %v963_v17 = vrot.slane %v3130_v13, 5 }
  0xa5   : > { %v1380_v12 = vsel %vm4187_vm4, %v1378_v7, %v1379_v62  ;;  %v4624_v16 = vld [vmem:[%s4932_s2] ss:$0 sm:$0xff]  ;;  %v1129_v18 = vrot.slane %v1127_v10, 4  ;;  %v1132_v19 = vrot.slane %v1130_v11, 5  ;;  %v3129_v21 = vld [vmem:[%s4129_s30 + $0x18] sm:$0xe] }
  0xa6   : > { %v1125_v9 = vsel %vm4206_vm5, %v1120_v2, %v1124_v55  ;;  %1447 = vst [vmem:[#allocation2 + $0x44] sm:$0xf] %v1380_v12  ;;  %v3131_v22 = vld [vmem:[%s4129_s30 + $0x20] sm:$0x1]  ;;  %v3151_v25 = vrot.slane %v3129_v21, 9  ;;  %v965_v26 = vrot.slane %v963_v17, 4 }
  0xa7   : > { %1311 = vst [vmem:[#allocation2 + $0x40] sm:$0xf] %v1125_v9  ;;  %v966_v27 = vrot.slane %v3131_v22, 5  ;;  %v3181_v28 = vld [vmem:[%s4129_s30 + $0x2c] sm:$0x1]  ;;  %v1133_v31 = vor.u32 %v1132_v19, %v1129_v18  ;;  %v1138_v32 = vrot.slane %v1136_v14, 5 }
  0xa8   : > { %v1142_v33 = vrot.slane %v1140_v15, 4  ;;  %v3203_v34 = vld [vmem:[%s4129_s30 + $0x24] sm:$0xe]  ;;  %v3204_v35 = vld [vmem:[%s4129_s30 + $0x28] sm:$0xf]  ;;  %v964_v37 = vsel %vm4187_vm4, %v3151_v25, %v963_v17  ;;  %v1146_v48 = vshll.u32 %v3181_v28, 16 }
  0xa9   : > { %v967_v38 = vsel %vm4187_vm4, %v965_v26, %v966_v27  ;;  %v3162_v39 = vld [vmem:[%s4129_s30 + $0x24] sm:$0xf]  ;;  %v3205_v40 = vld [vmem:[%s4129_s30 + $0x2c] sm:$0x1]  ;;  %v3874_v41 = vld [vmem:[#allocation2 + $0x1fc] sm:$0xf] }
  0xaa   : > { %v3488_v42 = vld [vmem:[#allocation2 + $0x21c] sm:$0xf0]  ;;  %v3879_v44 = vld [vmem:[#allocation2 + $0x220] sm:$0xf0]  ;;  %1028 = vst [vmem:[#allocation2 + $0x5c] sm:$0xf] %v964_v37  ;;  %v1143_v47 = vor.u32 %v1142_v33, %v1138_v32 }
  0xab   : > { %v4608_v63 = vpop.f32.mrf.mxu1  ;;  %v3494_v43 = vld [vmem:[#allocation2 + $0x200] sm:$0xf]  ;;  %v3163_v45 = vld [vmem:[%s4129_s30 + $0x28] sm:$0xf]  ;;  %v1134_v46 = vrot.slane %v1133_v31, 4  ;;  %v3225_v51 = vrot.slane %v3203_v34, 9  ;;  %v3491_v4 = vor.u32 %v3874_v41, %v3488_v42 }
  0xac   : > { %v3875_v49 = vld [vmem:[#allocation2 + $0x204] sm:$0xf]  ;;  %v3496_v50 = vld [vmem:[#allocation2 + $0x224] sm:$0xf0]  ;;  %1029 = vst [vmem:[#allocation2 + $0x80] sm:$0xf] %v967_v38  ;;  %v3495_v6 = vor.u32 %v3879_v44, %v3494_v43 }
  0xad   : > { %v4611_v5 = vpop.f32.mrf.mxu0  ;;  %v1383_v52 = vrot.slane %v3204_v35, 5  ;;  %v3502_v53 = vld [vmem:[#allocation2 + $0x208] sm:$0xf]  ;;  %1064 = vst [vmem:[#allocation2 + $0x60] sm:$0xf] %v3162_v39  ;;  %v1139_v54 = vsel %vm4206_vm5, %v1134_v46, %v1138_v32  ;;  %v1144_v55 = vrot.slane %v1143_v47, 4  ;;  %v3499_v10 = vor.u32 %v3875_v49, %v3496_v50 }
  0xae   : > { %2577 = vmatmul.bf16.gmra.mxu1 %v3455_v59  ;;  %2626 = vmatmul.bf16.gmra.mxu2 %v3459_v60  ;;  %v1148_v56 = vrot.slane %v1146_v48, 5  ;;  %v3880_v58 = vld [vmem:[#allocation2 + $0x228] sm:$0xf0]  ;;  %1065 = vst [vmem:[#allocation2 + $0x84] sm:$0xf] %v3163_v45  ;;  %v1386_v61 = vrot.slane %v3205_v40, 5 }
  0xaf   : > { %v1384_v59 = vsel %vm4187_vm4, %v3225_v51, %v1383_v52  ;;  %v1385_v60 = vrot.slane %v1383_v52, 4  ;;  %1312 = vst [vmem:[#allocation2 + $0x64] sm:$0xf] %v1139_v54  ;;  %v3503_v11 = vor.u32 %v3880_v58, %v3502_v53  ;;  %v3182_v12 = vld [vmem:[%s4129_s30 + $0x30] sm:$0xf] }
  0xb0   : > { %2675 = vmatmul.bf16.gmra.mxu3 %v3463_v0  ;;  %2724 = vmatmul.bf16.gmra.mxu0 %v3467_v1  ;;  %v1149_v0 = vsel %vm4206_vm5, %v1144_v55, %v1148_v56  ;;  %1448 = vst [vmem:[#allocation2 + $0x68] sm:$0xf] %v1384_v59  ;;  %v3183_v13 = vld [vmem:[%s4129_s30 + $0x34] sm:$0xf]  ;;  %v1151_v15 = vshrl.u32 %v3182_v12, 16  ;;  %v1154_v17 = vshll.u32 %v3182_v12, 16  ;;  %v2500_v12 = vadd.f32 %v4624_v16, %v4611_v5 }
  0xb1   : > { %v2519_v20 = vpop.f32.mrf.mxu2  ;;  %1313 = vst [vmem:[#allocation2 + $0x88] sm:$0xf] %v1149_v0  ;;  %v1387_v7 = vsel %vm4187_vm4, %v1385_v60, %v1386_v61  ;;  %v1160_v18 = vshll.u32 %v3183_v13, 16  ;;  %v3133_v21 = vld [vmem:[%s4129_s30 + $0x28] sm:$0xf]  ;;  %v1164_v22 = vshrl.u32 %v3183_v13, 16 }
  0xb2   : > { %v4629_v23 = vadd.f32 %v4624_v16, %v2519_v20  ;;  %1449 = vst [vmem:[#allocation2 + $0x8c] sm:$0xf] %v1387_v7  ;;  %v1153_v19 = vrot.slane %v1151_v15, 4  ;;  %v1156_v20 = vrot.slane %v1154_v17, 5  ;;  %v3184_v25 = vld [vmem:[%s4129_s30 + $0x38] sm:$0x1] }
  0xb3   : > { %v2529_v24 = vpop.f32.mrf.mxu3  ;;  %v4635_v30 = vpop.f32.mrf.mxu1  ;;  %v3132_v28 = vld [vmem:[%s4129_s30 + $0x24] sm:$0xe]  ;;  %v3134_v31 = vld [vmem:[%s4129_s30 + $0x2c] sm:$0x1]  ;;  %v1162_v32 = vrot.slane %v1160_v18, 5  ;;  %v1166_v42 = vrot.slane %v1164_v22, 4 }
  0xb4   : > { %v4633_v29 = vadd.f32 %v4624_v16, %v2529_v24  ;;  %v970_v24 = vrot.slane %v3133_v21, 5  ;;  %v1157_v26 = vor.u32 %v1156_v20, %v1153_v19  ;;  %v3152_v35 = vrot.slane %v3132_v28, 9  ;;  %v3207_v43 = vld [vmem:[%s4129_s30 + $0x34] sm:$0xf]  ;;  %v3164_v46 = vld [vmem:[%s4129_s30 + $0x30] sm:$0xf] }
  0xb5   : > { %v4639_v36 = vpop.f32.mrf.mxu0  ;;  %v973_v40 = vrot.slane %v3134_v31, 5  ;;  %v3165_v47 = vld [vmem:[%s4129_s30 + $0x34] sm:$0xf]  ;;  %v1170_v48 = vshll.u32 %v3184_v25, 16  ;;  %v3252_v50 = vld [vmem:[#allocation2 + $0x34] sm:$0xf0]  ;;  %v1167_v55 = vor.u32 %v1166_v42, %v1162_v32 }
  0xb6   : > { %v972_v37 = vrot.slane %v970_v24, 4  ;;  %v1158_v41 = vrot.slane %v1157_v26, 4  ;;  %v971_v45 = vsel %vm4187_vm4, %v3152_v35, %v970_v24  ;;  %v3813_v49 = vld [vmem:[#allocation2 + $0x14] sm:$0xf]  ;;  %v3258_v51 = vld [vmem:[#allocation2 + $0x18] sm:$0xf] }
  0xb7   : > { %v3818_v52 = vld [vmem:[#allocation2 + $0x38] sm:$0xf0]  ;;  %1030 = vst [vmem:[#allocation2 + $0xa4] sm:$0xf] %v971_v45  ;;  %v3206_v56 = vld [vmem:[%s4129_s30 + $0x30] sm:$0xe]  ;;  %v3255_v19 = vor.u32 %v3813_v49, %v3252_v50 }
  0xb8   : > { %v974_v53 = vsel %vm4187_vm4, %v972_v37, %v973_v40  ;;  %v1163_v54 = vsel %vm4206_vm5, %v1158_v41, %v1162_v32  ;;  %v3208_v58 = vld [vmem:[%s4129_s30 + $0x38] sm:$0x1]  ;;  %v3814_v59 = vld [vmem:[#allocation2 + $0x1c] sm:$0xf]  ;;  %v3266_v60 = vld [vmem:[#allocation2 + $0x20] sm:$0xf]  ;;  %v3259_v20 = vor.u32 %v3818_v52, %v3258_v51  ;;  %v2502_v51 = vadd.f32 %v4624_v16, %v4639_v36 }
  0xb9   : > { %v2521_v62 = vpop.f32.mrf.mxu2  ;;  %1031 = vst [vmem:[#allocation2 + $0xc8] sm:$0xf] %v974_v53  ;;  %v1172_v61 = vrot.slane %v1170_v48, 5  ;;  %v1390_v0 = vrot.slane %v3207_v43, 5  ;;  %v3819_v7 = vld [vmem:[#allocation2 + $0x40] sm:$0xf0] }
  0xba   : > { %v4655_v1 = vadd.f32 %v4624_v16, %v2521_v62  ;;  %v3226_v62 = vrot.slane %v3206_v56, 9  ;;  %1066 = vst [vmem:[#allocation2 + $0xa8] sm:$0xf] %v3164_v46  ;;  %v3267_v25 = vor.u32 %v3819_v7, %v3266_v60  ;;  %v3185_v26 = vld [vmem:[%s4129_s30 + $0x3c] sm:$0xf] }
  0xbb   : > { %v2531_v2 = vpop.f32.mrf.mxu3  ;;  %v4662_v9 = vpop.f32.mrf.mxu1  ;;  %1067 = vst [vmem:[#allocation2 + $0xcc] sm:$0xf] %v3165_v47  ;;  %v1175_v32 = vshrl.u32 %v3185_v26, 16  ;;  %v3136_v41 = vld [vmem:[%s4129_s30 + $0x34] sm:$0xf] }
  0xbc   : > { %v4660_v8 = vadd.f32 %v4624_v16, %v2531_v2  ;;  %v1393_v2 = vrot.slane %v3208_v58, 5  ;;  %1314 = vst [vmem:[#allocation2 + $0xac] sm:$0xf] %v1163_v54  ;;  %v977_v43 = vrot.slane %v3136_v41, 5  ;;  %v3187_v45 = vld [vmem:[%s4129_s30 + $0x44] sm:$0x1] }
  0xbd   : > { %v4666_v14 = vpop.f32.mrf.mxu0  ;;  %v1177_v37 = vrot.slane %v1175_v32, 4  ;;  %v3135_v48 = vld [vmem:[%s4129_s30 + $0x30] sm:$0xe]  ;;  %v3137_v49 = vld [vmem:[%s4129_s30 + $0x38] sm:$0x1] }
  0xbe   : > { %2582 = vmatmul.bf16.gmra.mxu1 %v3491_v4  ;;  %2631 = vmatmul.bf16.gmra.mxu2 %v3495_v6  ;;  %v3260_v4 = vld [vmem:[#allocation2 + $0x3c] sm:$0xf0]  ;;  %v1168_v6 = vrot.slane %v1167_v55, 4  ;;  %v3153_v54 = vrot.slane %v3135_v48, 9  ;;  %v979_v55 = vrot.slane %v977_v43, 4  ;;  %v980_v58 = vrot.slane %v3137_v49, 5 }
  0xbf   : > { %v3263_v24 = vor.u32 %v3814_v59, %v3260_v4  ;;  %v3166_v36 = vld [vmem:[%s4129_s30 + $0x3c] sm:$0xf]  ;;  %v3167_v7 = vld [vmem:[%s4129_s30 + $0x40] sm:$0xf] }
  0xc0   : > { %2680 = vmatmul.bf16.gmra.mxu3 %v3499_v10  ;;  %2729 = vmatmul.bf16.gmra.mxu0 %v3503_v11  ;;  %v1391_v10 = vsel %vm4187_vm4, %v3226_v62, %v1390_v0  ;;  %v1392_v11 = vrot.slane %v1390_v0, 4  ;;  %v1173_v15 = vsel %vm4206_vm5, %v1168_v6, %v1172_v61  ;;  %v1194_v61 = vshll.u32 %v3187_v45, 16  ;;  %v3210_v62 = vld [vmem:[%s4129_s30 + $0x40] sm:$0xf]  ;;  %1068 = vst [vmem:[#allocation2 + $0xf0] sm:$0xf] %v3166_v36 }
  0xc1   : > { %v2524_v27 = vpop.f32.mrf.mxu2  ;;  %1315 = vst [vmem:[#allocation2 + $0xd0] sm:$0xf] %v1173_v15  ;;  %v978_v6 = vsel %vm4187_vm4, %v3153_v54, %v977_v43  ;;  %v3827_v15 = vld [vmem:[#allocation2 + $0x80] sm:$0xf0] }
  0xc2   : > { %v4673_v33 = vadd.f32 %v4624_v16, %v2524_v27  ;;  %v1394_v21 = vsel %vm4187_vm4, %v1392_v11, %v1393_v2  ;;  %1450 = vst [vmem:[#allocation2 + $0xb0] sm:$0xf] %v1391_v10  ;;  %v3186_v27 = vld [vmem:[%s4129_s30 + $0x40] sm:$0xf]  ;;  %v3209_v10 = vld [vmem:[%s4129_s30 + $0x3c] sm:$0xe] }
  0xc3   : > { %v2534_v34 = vpop.f32.mrf.mxu3  ;;  %v4678_v39 = vpop.f32.mrf.mxu1  ;;  %1451 = vst [vmem:[#allocation2 + $0xd4] sm:$0xf] %v1394_v21  ;;  %v1184_v35 = vshll.u32 %v3186_v27, 16  ;;  %v1188_v42 = vshrl.u32 %v3186_v27, 16  ;;  %v3822_v11 = vld [vmem:[#allocation2 + $0x5c] sm:$0xf] }
  0xc4   : > { %v4676_v38 = vadd.f32 %v4624_v16, %v2534_v34  ;;  %v1178_v34 = vshll.u32 %v3185_v26, 16  ;;  %1032 = vst [vmem:[#allocation2 + $0xec] sm:$0xf] %v978_v6  ;;  %v1196_v21 = vrot.slane %v1194_v61, 5  ;;  %v3227_v26 = vrot.slane %v3209_v10, 9 }
  0xc5   : > { %v4681_v44 = vpop.f32.mrf.mxu0  ;;  %v1186_v50 = vrot.slane %v1184_v35, 5  ;;  %v1190_v60 = vrot.slane %v1188_v42, 4  ;;  %v1397_v27 = vrot.slane %v3210_v62, 5  ;;  %1069 = vst [vmem:[#allocation2 + $0x114] sm:$0xf] %v3167_v7  ;;  %v2505_v42 = vadd.f32 %v4624_v16, %v4666_v14 }
  0xc6   : > { %v1180_v40 = vrot.slane %v1178_v34, 5  ;;  %v3302_v34 = vld [vmem:[#allocation2 + $0x68] sm:$0xf]  ;;  %v3189_v14 = vld [vmem:[%s4129_s30 + $0x4c] sm:$0xf] }
  0xc7   : > { %v1399_v41 = vrot.slane %v1397_v27, 4  ;;  %v1212_v6 = vshrl.u32 %v3189_v14, 16  ;;  %v3190_v7 = vld [vmem:[%s4129_s30 + $0x50] sm:$0x1] }
  0xc8   : > { %v1181_v46 = vor.u32 %v1180_v40, %v1177_v37  ;;  %v3828_v37 = vld [vmem:[#allocation2 + $0x88] sm:$0xf0]  ;;  %v1398_v40 = vsel %vm4187_vm4, %v3227_v26, %v1397_v27  ;;  %v1218_v27 = vshll.u32 %v3190_v7, 16 }
  0xc9   : > { %v2526_v13 = vpop.f32.mrf.mxu2  ;;  %1452 = vst [vmem:[#allocation2 + $0xf8] sm:$0xf] %v1398_v40  ;;  %v1214_v26 = vrot.slane %v1212_v6, 4  ;;  %v2510_v6 = vadd.f32 %v4624_v16, %v4608_v63  ;;  %v3192_v63 = vld [vmem:[%s4129_s30 + $0x58] sm:$0xf] }
  0xca   : > { %v4700_v17 = vadd.f32 %v4624_v16, %v2526_v13  ;;  %v1182_v59 = vrot.slane %v1181_v46, 4  ;;  %v3294_v13 = vld [vmem:[#allocation2 + $0x60] sm:$0xf] }
  0xcb   : > { %v2536_v18 = vpop.f32.mrf.mxu3  ;;  %v2548_v5 = vpop.f32.mrf.mxu1  ;;  %v3295_v48 = vor.u32 %v3827_v15, %v3294_v13  ;;  %v3140_v13 = vld [vmem:[%s4129_s30 + $0x44] sm:$0x1] }
  0xcc   : > { %v4705_v22 = vadd.f32 %v4624_v16, %v2536_v18  ;;  %v2549_v28 = vadd.f32 %v2548_v5, %v2500_v12  ;;  %v3288_v12 = vld [vmem:[#allocation2 + $0x7c] sm:$0xf0]  ;;  %v981_v18 = vsel %vm4187_vm4, %v979_v55, %v980_v58  ;;  %v3211_v5 = vld [vmem:[%s4129_s30 + $0x44] sm:$0x1] }
  0xcd   : > { %v2695_v31 = vpop.f32.mrf.mxu0  ;;  %1033 = vst [vmem:[#allocation2 + $0x110] sm:$0xf] %v981_v18  ;;  %v2507_v18 = vadd.f32 %v4624_v16, %v4681_v44  ;;  %v3168_v44 = vld [vmem:[%s4129_s30 + $0x48] sm:$0xf] }
  0xce   : > { %2743 = vmatmul.bf16.vlgmr.msra.gmra.mxu1 %v3255_v19  ;;  %2792 = vmatmul.bf16.vlgmr.msra.gmra.mxu2 %v3259_v20  ;;  %v1187_v19 = vsel %vm4206_vm5, %v1182_v59, %v1186_v50  ;;  %v1191_v20 = vor.u32 %v1190_v60, %v1186_v50  ;;  %v1208_v60 = vshll.u32 %v3189_v14, 16  ;;  %1070 = vst [vmem:[#allocation2 + $0x138] sm:$0xf] %v3168_v44 }
  0xcf   : > { %1316 = vst [vmem:[#allocation2 + $0xf4] sm:$0xf] %v1187_v19 }
  0xd0   : > { %2841 = vmatmul.bf16.vlgmr.msra.gmra.mxu3 %v3263_v24  ;;  %2890 = vmatmul.bf16.vlgmr.msra.gmra.mxu0 %v3267_v25  ;;  %v3823_v24 = vld [vmem:[#allocation2 + $0x64] sm:$0xf]  ;;  %v3296_v25 = vld [vmem:[#allocation2 + $0x84] sm:$0xf0]  ;;  %v1192_v35 = vrot.slane %v1191_v20, 4  ;;  %v1210_v15 = vrot.slane %v1208_v60, 5 }
  0xd1   : > { %v2597_v47 = vpop.f32.mrf.mxu2 }
  0xd2   : > { %v2598_v52 = vadd.f32 %v2597_v47, %v2549_v28  ;;  %v1400_v28 = vrot.slane %v3211_v5, 5  ;;  %v1197_v45 = vsel %vm4206_vm5, %v1192_v35, %v1196_v21  ;;  %v3291_v47 = vor.u32 %v3822_v11, %v3288_v12  ;;  %v3138_v12 = vld [vmem:[%s4129_s30 + $0x3c] sm:$0xe] }
  0xd3   : > { %v2646_v53 = vpop.f32.mrf.mxu3  ;;  %v2550_v56 = vpop.f32.mrf.mxu1  ;;  %1317 = vst [vmem:[#allocation2 + $0x118] sm:$0xf] %v1197_v45  ;;  %v3154_v20 = vrot.slane %v3138_v12, 9  ;;  %v3324_v45 = vld [vmem:[#allocation2 + $0xc4] sm:$0xf0] }
  0xd4   : > { %v2647_v0 = vadd.f32 %v2646_v53, %v2598_v52  ;;  %v2551_v2 = vadd.f32 %v2550_v56, %v2502_v51  ;;  %v1401_v49 = vsel %vm4187_vm4, %v1399_v41, %v1400_v28  ;;  %v3299_v51 = vor.u32 %v3823_v24, %v3296_v25  ;;  %v3188_v53 = vld [vmem:[%s4129_s30 + $0x48] sm:$0xf]  ;;  %v3213_v28 = vld [vmem:[%s4129_s30 + $0x4c] sm:$0xf] }
  0xd5   : > { %v2697_v4 = vpop.f32.mrf.mxu0  ;;  %v3303_v52 = vor.u32 %v3828_v37, %v3302_v34  ;;  %1453 = vst [vmem:[#allocation2 + $0x11c] sm:$0xf] %v1401_v49  ;;  %v1199_v58 = vshrl.u32 %v3188_v53, 16  ;;  %v1202_v59 = vshll.u32 %v3188_v53, 16  ;;  %v987_v24 = vrot.slane %v3140_v13, 5 }
  0xd6   : > { %v4726_v32 = vadd.f32 %v2695_v31, %v2647_v0  ;;  %v3169_v41 = vld [vmem:[%s4129_s30 + $0x4c] sm:$0xf]  ;;  %v1215_v49 = vor.u32 %v1214_v26, %v1210_v15  ;;  %v3332_v53 = vld [vmem:[#allocation2 + $0xcc] sm:$0xf0]  ;;  %v1232_v26 = vshll.u32 %v3192_v63, 16 }
  0xd7   : > { %v1201_v61 = vrot.slane %v1199_v58, 4  ;;  %v1204_v62 = vrot.slane %v1202_v59, 5  ;;  %v3338_v59 = vld [vmem:[#allocation2 + $0xb0] sm:$0xf]  ;;  %1071 = vst [vmem:[#allocation2 + $0x15c] sm:$0xf] %v3169_v41 }
  0xd8   : > { %v1216_v60 = vrot.slane %v1215_v49, 4  ;;  %v3193_v41 = vld [vmem:[%s4129_s30 + $0x5c] sm:$0x1] }
  0xd9   : > { %v2599_v43 = vpop.f32.mrf.mxu2  ;;  %v1205_v10 = vor.u32 %v1204_v62, %v1201_v61  ;;  %v3837_v61 = vld [vmem:[#allocation2 + $0xd0] sm:$0xf0] }
  0xda   : > { %v2600_v31 = vadd.f32 %v2599_v43, %v2551_v2  ;;  %v3139_v2 = vld [vmem:[%s4129_s30 + $0x40] sm:$0xf]  ;;  %v3831_v43 = vld [vmem:[#allocation2 + $0xa4] sm:$0xf] }
  0xdb   : > { %v2648_v46 = vpop.f32.mrf.mxu3  ;;  %v2553_v50 = vpop.f32.mrf.mxu1  ;;  %v984_v36 = vrot.slane %v3139_v2, 5  ;;  %v1206_v25 = vrot.slane %v1205_v10, 4 }
  0xdc   : > { %v2649_v54 = vadd.f32 %v2648_v46, %v2600_v31  ;;  %v2554_v55 = vadd.f32 %v2553_v50, %v2505_v42  ;;  %v3212_v42 = vld [vmem:[%s4129_s30 + $0x48] sm:$0xe]  ;;  %v3836_v46 = vld [vmem:[#allocation2 + $0xc8] sm:$0xf0]  ;;  %v1220_v50 = vrot.slane %v1218_v27, 5 }
  0xdd   : > { %v2700_v56 = vpop.f32.mrf.mxu0  ;;  %v986_v21 = vrot.slane %v984_v36, 4  ;;  %v985_v40 = vsel %vm4187_vm4, %v3154_v20, %v984_v36  ;;  %v3330_v31 = vld [vmem:[#allocation2 + $0xa8] sm:$0xf]  ;;  %v3228_v14 = vrot.slane %v3212_v42, 9 }
  0xde   : > { %2748 = vmatmul.bf16.gmra.mxu1 %v3291_v47  ;;  %2797 = vmatmul.bf16.gmra.mxu2 %v3295_v48  ;;  %v4738_v0 = vadd.f32 %v2697_v4, %v2649_v54  ;;  %1034 = vst [vmem:[#allocation2 + $0x134] sm:$0xf] %v985_v40  ;;  %v1211_v48 = vsel %vm4206_vm5, %v1206_v25, %v1210_v15  ;;  %v1404_v54 = vrot.slane %v3213_v28, 5  ;;  %v1236_v40 = vshrl.u32 %v3192_v63, 16 }
  0xdf   : > { %v988_v47 = vsel %vm4187_vm4, %v986_v21, %v987_v24  ;;  %v1221_v7 = vsel %vm4206_vm5, %v1216_v60, %v1220_v50  ;;  %1318 = vst [vmem:[#allocation2 + $0x13c] sm:$0xf] %v1211_v48  ;;  %v3331_v12 = vor.u32 %v3836_v46, %v3330_v31  ;;  %v3143_v31 = vld [vmem:[%s4129_s30 + $0x50] sm:$0x1]  ;;  %v1234_v46 = vrot.slane %v1232_v26, 5 }
  0xe0   : > { %2846 = vmatmul.bf16.gmra.mxu3 %v3299_v51  ;;  %2895 = vmatmul.bf16.gmra.mxu0 %v3303_v52  ;;  %v3214_v51 = vld [vmem:[%s4129_s30 + $0x50] sm:$0x1]  ;;  %v3832_v52 = vld [vmem:[#allocation2 + $0xac] sm:$0xf]  ;;  %1035 = vst [vmem:[#allocation2 + $0x158] sm:$0xf] %v988_v47  ;;  %v1405_v62 = vsel %vm4187_vm4, %v3228_v14, %v1404_v54  ;;  %v2512_v47 = vadd.f32 %v4624_v16, %v4635_v30 }
  0xe1   : > { %v2602_v11 = vpop.f32.mrf.mxu2  ;;  %v1406_v2 = vrot.slane %v1404_v54, 4  ;;  %1319 = vst [vmem:[#allocation2 + $0x160] sm:$0xf] %v1221_v7  ;;  %v1238_v14 = vrot.slane %v1236_v40, 4  ;;  %v1242_v54 = vshll.u32 %v3193_v41, 16  ;;  %v2515_v40 = vadd.f32 %v4624_v16, %v4662_v9 }
  0xe2   : > { %v2603_v19 = vadd.f32 %v2602_v11, %v2554_v55  ;;  %v1407_v55 = vrot.slane %v3214_v51, 5  ;;  %v3327_v11 = vor.u32 %v3831_v43, %v3324_v45  ;;  %1454 = vst [vmem:[#allocation2 + $0x140] sm:$0xf] %v1405_v62  ;;  %v3141_v45 = vld [vmem:[%s4129_s30 + $0x48] sm:$0xe] }
  0xe3   : > { %v2651_v4 = vpop.f32.mrf.mxu3  ;;  %v2555_v5 = vpop.f32.mrf.mxu1  ;;  %v3155_v49 = vrot.slane %v3141_v45, 9  ;;  %v3170_v30 = vld [vmem:[%s4129_s30 + $0x54] sm:$0xf]  ;;  %v3360_v7 = vld [vmem:[#allocation2 + $0x10c] sm:$0xf0] }
  0xe4   : > { %v2652_v34 = vadd.f32 %v2651_v4, %v2603_v19  ;;  %v2556_v35 = vadd.f32 %v2555_v5, %v2507_v18  ;;  %v1408_v13 = vsel %vm4187_vm4, %v1406_v2, %v1407_v55  ;;  %v3335_v18 = vor.u32 %v3832_v52, %v3332_v53  ;;  %v3191_v4 = vld [vmem:[%s4129_s30 + $0x54] sm:$0xf]  ;;  %v3216_v55 = vld [vmem:[%s4129_s30 + $0x58] sm:$0xf]  ;;  %1072 = vst [vmem:[#allocation2 + $0x180] sm:$0xf] %v3170_v30 }
  0xe5   : > { %v2702_v37 = vpop.f32.mrf.mxu0  ;;  %v3339_v19 = vor.u32 %v3837_v61, %v3338_v59  ;;  %1455 = vst [vmem:[#allocation2 + $0x164] sm:$0xf] %v1408_v13  ;;  %v1223_v24 = vshrl.u32 %v3191_v4, 16  ;;  %v1226_v25 = vshll.u32 %v3191_v4, 16  ;;  %v994_v52 = vrot.slane %v3143_v31, 5 }
  0xe6   : > { %v4757_v58 = vadd.f32 %v2700_v56, %v2652_v34  ;;  %v3171_v2 = vld [vmem:[%s4129_s30 + $0x58] sm:$0xf]  ;;  %v1239_v13 = vor.u32 %v1238_v14, %v1234_v46  ;;  %v3195_v9 = vld [vmem:[%s4129_s30 + $0x64] sm:$0xf] }
  0xe7   : > { %v1225_v27 = vrot.slane %v1223_v24, 4  ;;  %v1228_v28 = vrot.slane %v1226_v25, 5  ;;  %v3368_v4 = vld [vmem:[#allocation2 + $0x114] sm:$0xf0]  ;;  %1073 = vst [vmem:[#allocation2 + $0x1a4] sm:$0xf] %v3171_v2 }
  0xe8   : > { %v3374_v25 = vld [vmem:[#allocation2 + $0xf8] sm:$0xf]  ;;  %v1240_v26 = vrot.slane %v1239_v13, 4  ;;  %v1256_v14 = vshll.u32 %v3195_v9, 16  ;;  %v3196_v2 = vld [vmem:[%s4129_s30 + $0x68] sm:$0x1] }
  0xe9   : > { %v2604_v36 = vpop.f32.mrf.mxu2  ;;  %v1229_v42 = vor.u32 %v1228_v28, %v1225_v27  ;;  %v3846_v27 = vld [vmem:[#allocation2 + $0x118] sm:$0xf0] }
  0xea   : > { %v2605_v56 = vadd.f32 %v2604_v36, %v2556_v35  ;;  %v3142_v35 = vld [vmem:[%s4129_s30 + $0x4c] sm:$0xf] }
  0xeb   : > { %v2653_v10 = vpop.f32.mrf.mxu3  ;;  %v2558_v15 = vpop.f32.mrf.mxu1  ;;  %v991_v44 = vrot.slane %v3142_v35, 5  ;;  %v1230_v53 = vrot.slane %v1229_v42, 4  ;;  %v3840_v36 = vld [vmem:[#allocation2 + $0xec] sm:$0xf] }
  0xec   : > { %v2654_v20 = vadd.f32 %v2653_v10, %v2605_v56  ;;  %v2559_v21 = vadd.f32 %v2558_v15, %v2510_v6  ;;  %v3215_v6 = vld [vmem:[%s4129_s30 + $0x54] sm:$0xe]  ;;  %v3366_v56 = vld [vmem:[#allocation2 + $0xf0] sm:$0xf]  ;;  %v1244_v15 = vrot.slane %v1242_v54, 5 }
  0xed   : > { %v2705_v5 = vpop.f32.mrf.mxu0  ;;  %v993_v50 = vrot.slane %v991_v44, 4  ;;  %v992_v62 = vsel %vm4187_vm4, %v3155_v49, %v991_v44  ;;  %v3845_v10 = vld [vmem:[#allocation2 + $0x110] sm:$0xf0]  ;;  %v3229_v63 = vrot.slane %v3215_v6, 9 }
  0xee   : > { %2753 = vmatmul.bf16.gmra.mxu1 %v3327_v11  ;;  %2802 = vmatmul.bf16.gmra.mxu2 %v3331_v12  ;;  %v4769_v34 = vadd.f32 %v2702_v37, %v2654_v20  ;;  %1036 = vst [vmem:[#allocation2 + $0x17c] sm:$0xf] %v992_v62  ;;  %v1235_v12 = vsel %vm4206_vm5, %v1230_v53, %v1234_v46  ;;  %v1411_v20 = vrot.slane %v3216_v55, 5  ;;  %v1260_v62 = vshrl.u32 %v3195_v9, 16 }
  0xef   : > { %v995_v11 = vsel %vm4187_vm4, %v993_v50, %v994_v52  ;;  %v1245_v41 = vsel %vm4206_vm5, %v1240_v26, %v1244_v15  ;;  %1320 = vst [vmem:[#allocation2 + $0x184] sm:$0xf] %v1235_v12  ;;  %v3367_v45 = vor.u32 %v3845_v10, %v3366_v56  ;;  %v3146_v56 = vld [vmem:[%s4129_s30 + $0x5c] sm:$0x1]  ;;  %v1258_v10 = vrot.slane %v1256_v14, 5 }
  0xf0   : > { %2851 = vmatmul.bf16.gmra.mxu3 %v3335_v18  ;;  %2900 = vmatmul.bf16.gmra.mxu0 %v3339_v19  ;;  %v3217_v18 = vld [vmem:[%s4129_s30 + $0x5c] sm:$0x1]  ;;  %v3841_v19 = vld [vmem:[#allocation2 + $0xf4] sm:$0xf]  ;;  %1037 = vst [vmem:[#allocation2 + $0x1a0] sm:$0xf] %v995_v11  ;;  %v1412_v28 = vsel %vm4187_vm4, %v3229_v63, %v1411_v20  ;;  %v2517_v11 = vadd.f32 %v4624_v16, %v4678_v39 }
  0xf1   : > { %v2607_v43 = vpop.f32.mrf.mxu2  ;;  %v1413_v35 = vrot.slane %v1411_v20, 4  ;;  %1321 = vst [vmem:[#allocation2 + $0x1a8] sm:$0xf] %v1245_v41  ;;  %v1262_v63 = vrot.slane %v1260_v62, 4  ;;  %v1266_v20 = vshll.u32 %v3196_v2, 16 }
  0xf2   : > { %v2608_v48 = vadd.f32 %v2607_v43, %v2559_v21  ;;  %v1414_v21 = vrot.slane %v3217_v18, 5  ;;  %v3363_v43 = vor.u32 %v3840_v36, %v3360_v7  ;;  %1456 = vst [vmem:[#allocation2 + $0x188] sm:$0xf] %v1412_v28  ;;  %v3144_v7 = vld [vmem:[%s4129_s30 + $0x54] sm:$0xe] }
  0xf3   : > { %v2656_v37 = vpop.f32.mrf.mxu3  ;;  %v2560_v51 = vpop.f32.mrf.mxu1  ;;  %v3156_v13 = vrot.slane %v3144_v7, 9  ;;  %v3172_v16 = vld [vmem:[%s4129_s30 + $0x60] sm:$0xf]  ;;  %v3173_v39 = vld [vmem:[%s4129_s30 + $0x64] sm:$0xf] }
  0xf4   : > { %v2657_v59 = vadd.f32 %v2656_v37, %v2608_v48  ;;  %v2561_v60 = vadd.f32 %v2560_v51, %v2512_v47  ;;  %v1415_v31 = vsel %vm4187_vm4, %v1413_v35, %v1414_v21  ;;  %v3371_v47 = vor.u32 %v3841_v19, %v3368_v4  ;;  %v3194_v37 = vld [vmem:[%s4129_s30 + $0x60] sm:$0xf]  ;;  %v3219_v21 = vld [vmem:[%s4129_s30 + $0x64] sm:$0xf]  ;;  %v3402_v41 = vld [vmem:[#allocation2 + $0x138] sm:$0xf] }
  0xf5   : > { %v2707_v61 = vpop.f32.mrf.mxu0  ;;  %v3375_v48 = vor.u32 %v3846_v27, %v3374_v25  ;;  %1457 = vst [vmem:[#allocation2 + $0x1ac] sm:$0xf] %v1415_v31  ;;  %v1247_v52 = vshrl.u32 %v3194_v37, 16  ;;  %v1250_v53 = vshll.u32 %v3194_v37, 16  ;;  %v1001_v19 = vrot.slane %v3146_v56, 5 }
  0xf6   : > { %v4788_v24 = vadd.f32 %v2705_v5, %v2657_v59  ;;  %v3218_v35 = vld [vmem:[%s4129_s30 + $0x60] sm:$0xe]  ;;  %v1268_v31 = vrot.slane %v1266_v20, 5  ;;  %v1418_v9 = vrot.slane %v3219_v21, 5  ;;  %1074 = vst [vmem:[#allocation2 + $0x1c8] sm:$0xf] %v3172_v16 }
  0xf7   : > { %v1249_v54 = vrot.slane %v1247_v52, 4  ;;  %v1252_v55 = vrot.slane %v1250_v53, 5  ;;  %v3230_v37 = vrot.slane %v3218_v35, 9  ;;  %v3410_v52 = vld [vmem:[#allocation2 + $0x140] sm:$0xf] }
  0xf8   : > { %v3855_v14 = vld [vmem:[#allocation2 + $0x160] sm:$0xf0]  ;;  %1075 = vst [vmem:[#allocation2 + $0x1ec] sm:$0xf] %v3173_v39  ;;  %v3147_v35 = vld [vmem:[%s4129_s30 + $0x60] sm:$0xe] }
  0xf9   : > { %v2609_v44 = vpop.f32.mrf.mxu2  ;;  %v1253_v6 = vor.u32 %v1252_v55, %v1249_v54  ;;  %v1419_v54 = vsel %vm4187_vm4, %v3230_v37, %v1418_v9  ;;  %v1420_v55 = vrot.slane %v1418_v9, 4 }
  0xfa   : > { %v2610_v5 = vadd.f32 %v2609_v44, %v2561_v60  ;;  %v3145_v60 = vld [vmem:[%s4129_s30 + $0x58] sm:$0xf]  ;;  %1458 = vst [vmem:[#allocation2 + $0x1d0] sm:$0xf] %v1419_v54  ;;  %v3221_v54 = vld [vmem:[%s4129_s30 + $0x6c] sm:$0xe] }
  0xfb   : > { %v2658_v42 = vpop.f32.mrf.mxu3  ;;  %v2563_v46 = vpop.f32.mrf.mxu1  ;;  %v998_v30 = vrot.slane %v3145_v60, 5  ;;  %v1254_v4 = vrot.slane %v1253_v6, 4  ;;  %v3396_v44 = vld [vmem:[#allocation2 + $0x154] sm:$0xf0] }
  0xfc   : > { %v2659_v49 = vadd.f32 %v2658_v42, %v2610_v5  ;;  %v2564_v50 = vadd.f32 %v2563_v46, %v2515_v40  ;;  %v3849_v40 = vld [vmem:[#allocation2 + $0x134] sm:$0xf]  ;;  %v3854_v5 = vld [vmem:[#allocation2 + $0x158] sm:$0xf0]  ;;  %v3220_v46 = vld [vmem:[%s4129_s30 + $0x68] sm:$0x1] }
  0xfd   : > { %v2710_v51 = vpop.f32.mrf.mxu0  ;;  %v1000_v15 = vrot.slane %v998_v30, 4  ;;  %v999_v28 = vsel %vm4187_vm4, %v3156_v13, %v998_v30  ;;  %v3403_v6 = vor.u32 %v3854_v5, %v3402_v41 }
  0xfe   : > { %2758 = vmatmul.bf16.gmra.mxu1 %v3363_v43  ;;  %2807 = vmatmul.bf16.gmra.mxu2 %v3367_v45  ;;  %v4800_v59 = vadd.f32 %v2707_v61, %v2659_v49  ;;  %1038 = vst [vmem:[#allocation2 + $0x1c4] sm:$0xf] %v999_v28  ;;  %v1259_v43 = vsel %vm4206_vm5, %v1254_v4, %v1258_v10  ;;  %v1421_v49 = vrot.slane %v3220_v46, 5 }
  0xff   : > { %v1002_v42 = vsel %vm4187_vm4, %v1000_v15, %v1001_v19  ;;  %v1263_v45 = vor.u32 %v1262_v63, %v1258_v10  ;;  %1322 = vst [vmem:[#allocation2 + $0x1cc] sm:$0xf] %v1259_v43  ;;  %v3411_v10 = vor.u32 %v3855_v14, %v3410_v52  ;;  %v3175_v14 = vld [vmem:[%s4129_s30 + $0x70] sm:$0xf] }
 0x100   : > { %2856 = vmatmul.bf16.gmra.mxu3 %v3371_v47  ;;  %2905 = vmatmul.bf16.gmra.mxu0 %v3375_v48  ;;  %v3850_v47 = vld [vmem:[#allocation2 + $0x13c] sm:$0xf]  ;;  %v3404_v48 = vld [vmem:[#allocation2 + $0x15c] sm:$0xf0]  ;;  %1039 = vst [vmem:[#allocation2 + $0x1e8] sm:$0xf] %v1002_v42 }
 0x101   : > { %v2612_v36 = vpop.f32.mrf.mxu2  ;;  %v1264_v53 = vrot.slane %v1263_v45, 4  ;;  %v3407_v56 = vor.u32 %v3850_v47, %v3404_v48  ;;  %v3157_v42 = vrot.slane %v3147_v35, 9  ;;  %v3222_v48 = vld [vmem:[%s4129_s30 + $0x70] sm:$0xf]  ;;  %1077 = vst [vmem:[#allocation2 + $0x234] sm:$0xf] %v3175_v14 }
 0x102   : > { %v2613_v12 = vadd.f32 %v2612_v36, %v2564_v50  ;;  %v1422_v36 = vsel %vm4187_vm4, %v1420_v55, %v1421_v49  ;;  %v3858_v55 = vld [vmem:[#allocation2 + $0x17c] sm:$0xf] }
 0x103   : > { %v2661_v61 = vpop.f32.mrf.mxu3  ;;  %v2565_v18 = vpop.f32.mrf.mxu1  ;;  %v1269_v62 = vsel %vm4206_vm5, %v1264_v53, %v1268_v31  ;;  %1459 = vst [vmem:[#allocation2 + $0x1f4] sm:$0xf] %v1422_v36  ;;  %v3174_v53 = vld [vmem:[%s4129_s30 + $0x6c] sm:$0xf]  ;;  %v3223_v36 = vld [vmem:[%s4129_s30 + $0x74] sm:$0x1] }
 0x104   : > { %v2662_v25 = vadd.f32 %v2661_v61, %v2613_v12  ;;  %v2566_v26 = vadd.f32 %v2565_v18, %v2517_v11  ;;  %1323 = vst [vmem:[#allocation2 + $0x1f0] sm:$0xf] %v1269_v62  ;;  %v3197_v11 = vld [vmem:[%s4129_s30 + $0x6c] sm:$0xf]  ;;  %v3198_v12 = vld [vmem:[%s4129_s30 + $0x70] sm:$0xf] }
 0x105   : > { %v2712_v27 = vpop.f32.mrf.mxu0  ;;  %v1271_v18 = vshrl.u32 %v3197_v11, 16  ;;  %v1274_v19 = vshll.u32 %v3197_v11, 16  ;;  %v1280_v4 = vshll.u32 %v3198_v12, 16  ;;  %v3438_v62 = vld [vmem:[#allocation2 + $0x180] sm:$0xf]  ;;  %v1425_v11 = vrot.slane %v3222_v48, 5 }
 0x106   : > { %v4819_v50 = vadd.f32 %v2710_v51, %v2662_v25  ;;  %v3399_v51 = vor.u32 %v3849_v40, %v3396_v44  ;;  %v3148_v25 = vld [vmem:[%s4129_s30 + $0x64] sm:$0xf]  ;;  %v3149_v40 = vld [vmem:[%s4129_s30 + $0x68] sm:$0x1]  ;;  %1076 = vst [vmem:[#allocation2 + $0x210] sm:$0xf] %v3174_v53 }
 0x107   : > { %v1273_v63 = vrot.slane %v1271_v18, 4  ;;  %v1276_v20 = vrot.slane %v1274_v19, 5  ;;  %v1005_v28 = vrot.slane %v3148_v25, 5  ;;  %v1282_v44 = vrot.slane %v1280_v4, 5  ;;  %v3864_v19 = vld [vmem:[#allocation2 + $0x1a8] sm:$0xf0] }
 0x108   : > { %v1008_v45 = vrot.slane %v3149_v40, 5  ;;  %v3468_v48 = vld [vmem:[#allocation2 + $0x1e4] sm:$0xf0] }
 0x109   : > { %v2614_v60 = vpop.f32.mrf.mxu2  ;;  %v1277_v16 = vor.u32 %v1276_v20, %v1273_v63  ;;  %v1006_v52 = vsel %vm4187_vm4, %v3157_v42, %v1005_v28  ;;  %v1427_v63 = vrot.slane %v1425_v11, 4 }
 0x10a   : > { %v2615_v30 = vadd.f32 %v2614_v60, %v2566_v26  ;;  %v1284_v26 = vshrl.u32 %v3198_v12, 16  ;;  %v3432_v60 = vld [vmem:[#allocation2 + $0x19c] sm:$0xf0]  ;;  %1040 = vst [vmem:[#allocation2 + $0x20c] sm:$0xf] %v1006_v52  ;;  %v1428_v12 = vrot.slane %v3223_v36, 5 }
 0x10b   : > { %v2663_v2 = vpop.f32.mrf.mxu3  ;;  %v2568_v7 = vpop.f32.mrf.mxu1  ;;  %v1278_v31 = vrot.slane %v1277_v16, 4  ;;  %v3868_v52 = vld [vmem:[#allocation2 + $0x1cc] sm:$0xf]  ;;  %v3476_v53 = vld [vmem:[#allocation2 + $0x1ec] sm:$0xf0] }
 0x10c   : > { %v2664_v61 = vadd.f32 %v2663_v2, %v2615_v30  ;;  %v2569_v13 = vadd.f32 %v2568_v7, %v4629_v23  ;;  %v3199_v23 = vld [vmem:[%s4129_s30 + $0x74] sm:$0x1]  ;;  %v1286_v46 = vrot.slane %v1284_v26, 4  ;;  %v3863_v30 = vld [vmem:[#allocation2 + $0x1a0] sm:$0xf0]  ;;  %s3069_s30 = sshll.u32 %s4043_s12, 3 }
 0x10d   : > { %v2715_v15 = vpop.f32.mrf.mxu0  ;;  %v1290_v47 = vshll.u32 %v3199_v23, 16  ;;  %v3859_v7 = vld [vmem:[#allocation2 + $0x184] sm:$0xf]  ;;  %v3435_v23 = vor.u32 %v3858_v55, %v3432_v60  ;;  %v3439_v16 = vor.u32 %v3863_v30, %v3438_v62  ;;  %v3873_v14 = vld [vmem:[#allocation2 + $0x1f0] sm:$0xf0]  ;;  %p188_p6 = scmp.lt.s32.totalorder %s3069_s30, 15 }
 0x10e   : > { %2763 = vmatmul.bf16.gmra.mxu1 %v3399_v51  ;;  %2812 = vmatmul.bf16.gmra.mxu2 %v3403_v6  ;;  %v4830_v21 = vadd.f32 %v2712_v27, %v2664_v61  ;;  %v1007_v27 = vrot.slane %v1005_v28, 4  ;;  %v1283_v51 = vsel %vm4206_vm5, %v1278_v31, %v1282_v44  ;;  %v1287_v6 = vor.u32 %v1286_v46, %v1282_v44 }
 0x10f   : > { %1324 = vst [vmem:[#allocation2 + $0x214] sm:$0xf] %v1283_v51  ;;  %v3479_v51 = vor.u32 %v3868_v52, %v3476_v53  ;;  %s4951_s30 = smov (!%p188_p6, %s3069_s30), 15 }
 0x110   : > { %2861 = vmatmul.bf16.gmra.mxu3 %v3407_v56  ;;  %2910 = vmatmul.bf16.gmra.mxu0 %v3411_v10  ;;  %v1009_v2 = vsel %vm4187_vm4, %v1007_v27, %v1008_v45  ;;  %v3440_v56 = vld [vmem:[#allocation2 + $0x1a4] sm:$0xf0]  ;;  %v3231_v10 = vrot.slane %v3221_v54, 9  ;;  %v1288_v18 = vrot.slane %v1287_v6, 4  ;;  %s3070_s11 = sshll.u32 %s4951_s30, 1 }
 0x111   : > { %v2617_v39 = vpop.f32.mrf.mxu2  ;;  %1041 = vst [vmem:[#allocation2 + $0x230] sm:$0xf] %v1009_v2  ;;  %v3443_v35 = vor.u32 %v3859_v7, %v3440_v56  ;;  %s192_s12 = sadd.s32 %s3071_s19, %s3070_s11 }
 0x112   : > { %v2618_v41 = vadd.f32 %v2617_v39, %v2569_v13  ;;  %v3446_v13 = vld [vmem:[#allocation2 + $0x188] sm:$0xf]  ;;  %v1426_v4 = vsel %vm4187_vm4, %v3231_v10, %v1425_v11  ;;  %s3072_s20 = sshll.u32 %s192_s12, 3 }
 0x113   : > { %v2666_v5 = vpop.f32.mrf.mxu3  ;;  %v2570_v43 = vpop.f32.mrf.mxu1  ;;  %v3447_v40 = vor.u32 %v3864_v19, %v3446_v13  ;;  %1460 = vst [vmem:[#allocation2 + $0x218] sm:$0xf] %v1426_v4  ;;  %v3876_v4 = vld [vmem:[#allocation2 + $0x20c] sm:$0xf]  ;;  %s4882_s23 = scalar_lea.vmem %s4933_s3, %s3072_s20 }
 0x114   : > { %v2667_v37 = vadd.f32 %v2666_v5, %v2618_v41  ;;  %v2571_v9 = vadd.f32 %v2570_v43, %v4655_v1  ;;  %v1292_v1 = vrot.slane %v1290_v47, 5  ;;  %v3867_v47 = vld [vmem:[#allocation2 + $0x1c4] sm:$0xf] }
 0x115   : > { %v2717_v49 = vpop.f32.mrf.mxu0  ;;  %v3471_v62 = vor.u32 %v3867_v47, %v3468_v48 }
 0x116   : > { %v4848_v61 = vadd.f32 %v2715_v15, %v2667_v37  ;;  %v1293_v25 = vsel %vm4206_vm5, %v1288_v18, %v1292_v1  ;;  %v1429_v15 = vsel %vm4187_vm4, %v1427_v63, %v1428_v12 }
 0x117   : > { %1325 = vst [vmem:[#allocation2 + $0x238] sm:$0xf] %v1293_v25  ;;  %v3881_v25 = vld [vmem:[#allocation2 + $0x230] sm:$0xf0] }
 0x118   : > { %1461 = vst [vmem:[#allocation2 + $0x23c] sm:$0xf] %v1429_v15  ;;  %v3504_v63 = vld [vmem:[#allocation2 + $0x22c] sm:$0xf0] }
 0x119   : > { %v2619_v20 = vpop.f32.mrf.mxu2 }
 0x11a   : > { %v2620_v26 = vadd.f32 %v2619_v20, %v2571_v9  ;;  %v3872_v9 = vld [vmem:[#allocation2 + $0x1e8] sm:$0xf0] }
 0x11b   : > { %v2668_v28 = vpop.f32.mrf.mxu3  ;;  %v2573_v39 = vpop.f32.mrf.mxu1 }
 0x11c   : > { %v2669_v44 = vadd.f32 %v2668_v28, %v2620_v26  ;;  %v2574_v41 = vadd.f32 %v2573_v39, %v4673_v33  ;;  %v3474_v33 = vld [vmem:[#allocation2 + $0x1c8] sm:$0xf]  ;;  %v3877_v26 = vld [vmem:[#allocation2 + $0x214] sm:$0xf] }
 0x11d   : > { %v2720_v5 = vpop.f32.mrf.mxu0  ;;  %v3475_v30 = vor.u32 %v3872_v9, %v3474_v33 }
 0x11e   : > { %2768 = vmatmul.bf16.gmra.mxu1 %v3435_v23  ;;  %2817 = vmatmul.bf16.gmra.mxu2 %v3439_v16  ;;  %v4857_v3 = vadd.f32 %v2717_v49, %v2669_v44  ;;  %v3482_v49 = vld [vmem:[#allocation2 + $0x1d0] sm:$0xf]  ;;  %v3512_v28 = vld [vmem:[#allocation2 + $0x234] sm:$0xf0] }
 0x11f   : > { %v3483_v6 = vor.u32 %v3873_v14, %v3482_v49  ;;  %v3518_v23 = vld [vmem:[#allocation2 + $0x218] sm:$0xf]  ;;  %v3882_v16 = vld [vmem:[#allocation2 + $0x238] sm:$0xf0] }
 0x120   : > { %2866 = vmatmul.bf16.gmra.mxu3 %v3443_v35  ;;  %2915 = vmatmul.bf16.gmra.mxu0 %v3447_v40  ;;  %v3507_v40 = vor.u32 %v3876_v4, %v3504_v63 }
 0x121   : > { %v2622_v42 = vpop.f32.mrf.mxu2 }
 0x122   : > { %v2623_v27 = vadd.f32 %v2622_v42, %v2574_v41 }
 0x123   : > { %v2671_v43 = vpop.f32.mrf.mxu3  ;;  %v2575_v57 = vpop.f32.mrf.mxu1 }
 0x124   : > { %v2672_v45 = vadd.f32 %v2671_v43, %v2623_v27  ;;  %v2576_v31 = vadd.f32 %v2575_v57, %v4700_v17 }
 0x125   : > { %v2722_v46 = vpop.f32.mrf.mxu0 }
 0x126   : > { %v4860_v37 = vadd.f32 %v2720_v5, %v2672_v45  ;;  %v3515_v5 = vor.u32 %v3877_v26, %v3512_v28 }
 0x129   : > { %v2624_v54 = vpop.f32.mrf.mxu2 }
 0x12a   : > { %v2625_v55 = vadd.f32 %v2624_v54, %v2576_v31 }
 0x12b   : > { %v2673_v60 = vpop.f32.mrf.mxu3  ;;  %v2578_v2 = vpop.f32.mrf.mxu1 }
 0x12c   : > { %v2674_v17 = vadd.f32 %v2673_v60, %v2625_v55  ;;  %v2579_v1 = vadd.f32 %v2578_v2, %v4633_v29  ;;  %v3510_v29 = vld [vmem:[#allocation2 + $0x210] sm:$0xf] }
 0x12d   : > { %v2725_v36 = vpop.f32.mrf.mxu0  ;;  %v3511_v44 = vor.u32 %v3881_v25, %v3510_v29 }
 0x12e   : > { %2773 = vmatmul.bf16.gmra.mxu1 %v3471_v62  ;;  %2822 = vmatmul.bf16.gmra.mxu2 %v3475_v30  ;;  %v4863_v7 = vadd.f32 %v2722_v46, %v2674_v17 }
 0x130   : > { %2871 = vmatmul.bf16.gmra.mxu3 %v3479_v51  ;;  %2920 = vmatmul.bf16.gmra.mxu0 %v3483_v6 }
 0x131   : > { %v2627_v56 = vpop.f32.mrf.mxu2 }
 0x132   : > { %v2628_v10 = vadd.f32 %v2627_v56, %v2579_v1 }
 0x133   : > { %v2676_v11 = vpop.f32.mrf.mxu3  ;;  %v2580_v12 = vpop.f32.mrf.mxu1 }
 0x134   : > { %v2677_v13 = vadd.f32 %v2676_v11, %v2628_v10  ;;  %v2581_v18 = vadd.f32 %v2580_v12, %v4660_v8  ;;  %v3519_v8 = vor.u32 %v3882_v16, %v3518_v23 }
 0x135   : > { %v2727_v19 = vpop.f32.mrf.mxu0 }
 0x136   : > { %v4866_v20 = vadd.f32 %v2725_v36, %v2677_v13 }
 0x139   : > { %v2629_v15 = vpop.f32.mrf.mxu2 }
 0x13a   : > { %v2630_v39 = vadd.f32 %v2629_v15, %v2581_v18 }
 0x13b   : > { %v2678_v35 = vpop.f32.mrf.mxu3  ;;  %v2583_v41 = vpop.f32.mrf.mxu1 }
 0x13c   : > { %v2679_v42 = vadd.f32 %v2678_v35, %v2630_v39  ;;  %v2584_v27 = vadd.f32 %v2583_v41, %v4676_v38 }
 0x13d   : > { %v2730_v43 = vpop.f32.mrf.mxu0 }
 0x13e   : > { %2778 = vmatmul.bf16.gmra.mxu1 %v3507_v40  ;;  %2827 = vmatmul.bf16.gmra.mxu2 %v3511_v44  ;;  %v4869_v57 = vadd.f32 %v2727_v19, %v2679_v42 }
 0x140   : > { %2876 = vmatmul.bf16.gmra.mxu3 %v3515_v5  ;;  %2925 = vmatmul.bf16.gmra.mxu0 %v3519_v8 }
 0x141   : > { %v2632_v45 = vpop.f32.mrf.mxu2 }
 0x142   : > { %v2633_v31 = vadd.f32 %v2632_v45, %v2584_v27 }
 0x143   : > { %v2681_v46 = vpop.f32.mrf.mxu3  ;;  %v2585_v47 = vpop.f32.mrf.mxu1 }
 0x144   : > { %v2682_v48 = vadd.f32 %v2681_v46, %v2633_v31  ;;  %v2586_v33 = vadd.f32 %v2585_v47, %v4705_v22 }
 0x145   : > { %v2732_v9 = vpop.f32.mrf.mxu0 }
 0x146   : > { %v4873_v52 = vadd.f32 %v2730_v43, %v2682_v48 }
 0x149   : > { %v2634_v38 = vpop.f32.mrf.mxu2 }
 0x14a   : > { %v2635_v53 = vadd.f32 %v2634_v38, %v2586_v33 }
 0x14b   : > { %v2683_v49 = vpop.f32.mrf.mxu3  ;;  %v2744_v14 = vpop.f32.mrf.mxu1 }
 0x14c   : > { %v2684_v54 = vadd.f32 %v2683_v49, %v2635_v53  ;;  %v2745_v62 = vadd.f32 %v2744_v14, %v4726_v32 }
 0x14d   : > { %v2891_v55 = vpop.f32.mrf.mxu0 }
 0x14e   : > { %v4876_v60 = vadd.f32 %v2732_v9, %v2684_v54 }
 0x151   : > { %v2793_v30 = vpop.f32.mrf.mxu2 }
 0x152   : > { %v2794_v22 = vadd.f32 %v2793_v30, %v2745_v62 }
 0x153   : > { %v2842_v2 = vpop.f32.mrf.mxu3  ;;  %v2746_v51 = vpop.f32.mrf.mxu1 }
 0x154   : > { %v2843_v6 = vadd.f32 %v2842_v2, %v2794_v22  ;;  %v2747_v56 = vadd.f32 %v2746_v51, %v4738_v0 }
 0x155   : > { %v2893_v17 = vpop.f32.mrf.mxu0 }
 0x156   : > { %v2892_v1 = vadd.f32 %v2891_v55, %v2843_v6 }
 0x158   : > { %v2931_v36 = vmax.f32 %v2892_v1, 0.0 }
 0x159   : > { %v2795_v32 = vpop.f32.mrf.mxu2 }
 0x15a   : > { %2947 = vst [vmem:[%s4882_s23] sm:$0xff] %v2931_v36  ;;  %v2796_v10 = vadd.f32 %v2795_v32, %v2747_v56 }
 0x15b   : > { %v2844_v11 = vpop.f32.mrf.mxu3  ;;  %v2749_v12 = vpop.f32.mrf.mxu1 }
 0x15c   : > { %v2845_v13 = vadd.f32 %v2844_v11, %v2796_v10  ;;  %v2750_v63 = vadd.f32 %v2749_v12, %v4757_v58 }
 0x15d   : > { %v2896_v18 = vpop.f32.mrf.mxu0 }
 0x15e   : > { %v2894_v19 = vadd.f32 %v2893_v17, %v2845_v13 }
 0x160   : > { %v2932_v4 = vmax.f32 %v2894_v19, 0.0 }
 0x161   : > { %v2798_v29 = vpop.f32.mrf.mxu2 }
 0x162   : > { %2948 = vst [vmem:[%s4882_s23 + $0x8] sm:$0xff] %v2932_v4  ;;  %v2799_v25 = vadd.f32 %v2798_v29, %v2750_v63 }
 0x163   : > { %v2847_v26 = vpop.f32.mrf.mxu3  ;;  %v2751_v28 = vpop.f32.mrf.mxu1 }
 0x164   : > { %v2848_v23 = vadd.f32 %v2847_v26, %v2799_v25  ;;  %v2752_v39 = vadd.f32 %v2751_v28, %v4769_v34 }
 0x165   : > { %v2898_v0 = vpop.f32.mrf.mxu0 }
 0x166   : > { %v2897_v16 = vadd.f32 %v2896_v18, %v2848_v23 }
 0x168   : > { %v2933_v15 = vmax.f32 %v2897_v16, 0.0 }
 0x169   : > { %v2800_v35 = vpop.f32.mrf.mxu2 }
 0x16a   : > { %2949 = vst [vmem:[%s4882_s23 + $0x10] sm:$0xff] %v2933_v15  ;;  %v2801_v40 = vadd.f32 %v2800_v35, %v2752_v39 }
 0x16b   : > { %v2849_v44 = vpop.f32.mrf.mxu3  ;;  %v2754_v41 = vpop.f32.mrf.mxu1 }
 0x16c   : > { %v2850_v5 = vadd.f32 %v2849_v44, %v2801_v40  ;;  %v2755_v27 = vadd.f32 %v2754_v41, %v4788_v24 }
 0x16d   : > { %v2901_v58 = vpop.f32.mrf.mxu0 }
 0x16e   : > { %v2899_v8 = vadd.f32 %v2898_v0, %v2850_v5 }
 0x170   : > { %v2934_v42 = vmax.f32 %v2899_v8, 0.0 }
 0x171   : > { %v2803_v43 = vpop.f32.mrf.mxu2 }
 0x172   : > { %2950 = vst [vmem:[%s4882_s23 + $0x18] sm:$0xff] %v2934_v42  ;;  %v2804_v45 = vadd.f32 %v2803_v43, %v2755_v27 }
 0x173   : > { %v2852_v31 = vpop.f32.mrf.mxu3  ;;  %v2756_v46 = vpop.f32.mrf.mxu1 }
 0x174   : > { %v2853_v47 = vadd.f32 %v2852_v31, %v2804_v45  ;;  %v2757_v9 = vadd.f32 %v2756_v46, %v4800_v59 }
 0x175   : > { %v2903_v34 = vpop.f32.mrf.mxu0 }
 0x176   : > { %v2902_v48 = vadd.f32 %v2901_v58, %v2853_v47 }
 0x178   : > { %v2935_v33 = vmax.f32 %v2902_v48, 0.0 }
 0x179   : > { %v2805_v38 = vpop.f32.mrf.mxu2 }
 0x17a   : > { %2951 = vst [vmem:[%s4882_s23 + $0x20] sm:$0xff] %v2935_v33  ;;  %v2806_v53 = vadd.f32 %v2805_v38, %v2757_v9 }
 0x17b   : > { %v2854_v49 = vpop.f32.mrf.mxu3  ;;  %v2759_v14 = vpop.f32.mrf.mxu1 }
 0x17c   : > { %v2855_v54 = vadd.f32 %v2854_v49, %v2806_v53  ;;  %v2760_v30 = vadd.f32 %v2759_v14, %v4819_v50 }
 0x17d   : > { %v2906_v24 = vpop.f32.mrf.mxu0 }
 0x17e   : > { %v2904_v55 = vadd.f32 %v2903_v34, %v2855_v54 }
 0x180   : > { %v2936_v62 = vmax.f32 %v2904_v55, 0.0 }
 0x181   : > { %v2808_v22 = vpop.f32.mrf.mxu2 }
 0x182   : > { %2952 = vst [vmem:[%s4882_s23 + $0x28] sm:$0xff] %v2936_v62  ;;  %v2809_v2 = vadd.f32 %v2808_v22, %v2760_v30 }
 0x183   : > { %v2857_v51 = vpop.f32.mrf.mxu3  ;;  %v2761_v6 = vpop.f32.mrf.mxu1 }
 0x184   : > { %v2858_v17 = vadd.f32 %v2857_v51, %v2809_v2  ;;  %v2762_v56 = vadd.f32 %v2761_v6, %v4830_v21 }
 0x185   : > { %v2908_v59 = vpop.f32.mrf.mxu0 }
 0x186   : > { %v2907_v1 = vadd.f32 %v2906_v24, %v2858_v17 }
 0x188   : > { %v2937_v36 = vmax.f32 %v2907_v1, 0.0 }
 0x189   : > { %v2810_v32 = vpop.f32.mrf.mxu2 }
 0x18a   : > { %2953 = vst [vmem:[%s4882_s23 + $0x30] sm:$0xff] %v2937_v36  ;;  %v2811_v10 = vadd.f32 %v2810_v32, %v2762_v56 }
 0x18b   : > { %v2859_v11 = vpop.f32.mrf.mxu3  ;;  %v2764_v12 = vpop.f32.mrf.mxu1 }
 0x18c   : > { %v2860_v13 = vadd.f32 %v2859_v11, %v2811_v10  ;;  %v2765_v4 = vadd.f32 %v2764_v12, %v4848_v61 }
 0x18d   : > { %v2911_v50 = vpop.f32.mrf.mxu0 }
 0x18e   : > { %v2909_v18 = vadd.f32 %v2908_v59, %v2860_v13 }
 0x190   : > { %v2938_v19 = vmax.f32 %v2909_v18, 0.0 }
 0x191   : > { %v2813_v63 = vpop.f32.mrf.mxu2 }
 0x192   : > { %2954 = vst [vmem:[%s4882_s23 + $0x38] sm:$0xff] %v2938_v19  ;;  %v2814_v29 = vadd.f32 %v2813_v63, %v2765_v4 }
 0x193   : > { %v2862_v25 = vpop.f32.mrf.mxu3  ;;  %v2766_v26 = vpop.f32.mrf.mxu1 }
 0x194   : > { %v2863_v28 = vadd.f32 %v2862_v25, %v2814_v29  ;;  %v2767_v16 = vadd.f32 %v2766_v26, %v4857_v3 }
 0x195   : > { %v2913_v21 = vpop.f32.mrf.mxu0 }
 0x196   : > { %v2912_v23 = vadd.f32 %v2911_v50, %v2863_v28 }
 0x198   : > { %v2939_v0 = vmax.f32 %v2912_v23, 0.0 }
 0x199   : > { %v2815_v15 = vpop.f32.mrf.mxu2 }
 0x19a   : > { %2955 = vst [vmem:[%s4882_s23 + $0x40] sm:$0xff] %v2939_v0  ;;  %v2816_v39 = vadd.f32 %v2815_v15, %v2767_v16 }
 0x19b   : > { %v2864_v35 = vpop.f32.mrf.mxu3  ;;  %v2769_v40 = vpop.f32.mrf.mxu1 }
 0x19c   : > { %v2865_v44 = vadd.f32 %v2864_v35, %v2816_v39  ;;  %v2770_v58 = vadd.f32 %v2769_v40, %v4860_v37 }
 0x19d   : > { %v2916_v61 = vpop.f32.mrf.mxu0 }
 0x19e   : > { %v2914_v41 = vadd.f32 %v2913_v21, %v2865_v44 }
 0x1a0   : > { %v2940_v5 = vmax.f32 %v2914_v41, 0.0 }
 0x1a1   : > { %v2818_v8 = vpop.f32.mrf.mxu2 }
 0x1a2   : > { %2956 = vst [vmem:[%s4882_s23 + $0x48] sm:$0xff] %v2940_v5  ;;  %v2819_v42 = vadd.f32 %v2818_v8, %v2770_v58 }
 0x1a3   : > { %v2867_v27 = vpop.f32.mrf.mxu3  ;;  %v2771_v43 = vpop.f32.mrf.mxu1 }
 0x1a4   : > { %v2868_v45 = vadd.f32 %v2867_v27, %v2819_v42  ;;  %v2772_v47 = vadd.f32 %v2771_v43, %v4863_v7 }
 0x1a5   : > { %v2918_v3 = vpop.f32.mrf.mxu0 }
 0x1a6   : > { %v2917_v31 = vadd.f32 %v2916_v61, %v2868_v45 }
 0x1a8   : > { %v2941_v46 = vmax.f32 %v2917_v31, 0.0 }
 0x1a9   : > { %v2820_v34 = vpop.f32.mrf.mxu2 }
 0x1aa   : > { %2957 = vst [vmem:[%s4882_s23 + $0x50] sm:$0xff] %v2941_v46  ;;  %v2821_v48 = vadd.f32 %v2820_v34, %v2772_v47 }
 0x1ab   : > { %v2869_v33 = vpop.f32.mrf.mxu3  ;;  %v2774_v9 = vpop.f32.mrf.mxu1 }
 0x1ac   : > { %v2870_v38 = vadd.f32 %v2869_v33, %v2821_v48  ;;  %v2775_v14 = vadd.f32 %v2774_v9, %v4866_v20 }
 0x1ad   : > { %v2921_v53 = vpop.f32.mrf.mxu0 }
 0x1ae   : > { %v2919_v37 = vadd.f32 %v2918_v3, %v2870_v38 }
 0x1b0   : > { %v2942_v49 = vmax.f32 %v2919_v37, 0.0 }
 0x1b1   : > { %v2823_v54 = vpop.f32.mrf.mxu2 }
 0x1b2   : > { %2958 = vst [vmem:[%s4882_s23 + $0x58] sm:$0xff] %v2942_v49  ;;  %v2824_v24 = vadd.f32 %v2823_v54, %v2775_v14 }
 0x1b3   : > { %v2872_v55 = vpop.f32.mrf.mxu3  ;;  %v2776_v62 = vpop.f32.mrf.mxu1 }
 0x1b4   : > { %v2873_v30 = vadd.f32 %v2872_v55, %v2824_v24  ;;  %v2777_v2 = vadd.f32 %v2776_v62, %v4869_v57 }
 0x1b5   : > { %v2923_v51 = vpop.f32.mrf.mxu0 }
 0x1b6   : > { %v2922_v7 = vadd.f32 %v2921_v53, %v2873_v30 }
 0x1b8   : > { %v2943_v22 = vmax.f32 %v2922_v7, 0.0 }
 0x1b9   : > { %v2825_v6 = vpop.f32.mrf.mxu2 }
 0x1ba   : > { %2959 = vst [vmem:[%s4882_s23 + $0x60] sm:$0xff] %v2943_v22  ;;  %v2826_v17 = vadd.f32 %v2825_v6, %v2777_v2 }
 0x1bb   : > { %v2874_v59 = vpop.f32.mrf.mxu3  ;;  %v2779_v1 = vpop.f32.mrf.mxu1 }
 0x1bc   : > { %v2875_v36 = vadd.f32 %v2874_v59, %v2826_v17  ;;  %v2780_v32 = vadd.f32 %v2779_v1, %v4873_v52 }
 0x1bd   : > { %v2926_v13 = vpop.f32.mrf.mxu0 }
 0x1be   : > { %v2924_v20 = vadd.f32 %v2923_v51, %v2875_v36 }
 0x1c0   : > { %v2944_v56 = vmax.f32 %v2924_v20, 0.0 }
 0x1c1   : > { %v2828_v10 = vpop.f32.mrf.mxu2 }
 0x1c2   : > { %2960 = vst [vmem:[%s4882_s23 + $0x68] sm:$0xff] %v2944_v56  ;;  %v2829_v11 = vadd.f32 %v2828_v10, %v2780_v32 }
 0x1c3   : > { %v2877_v12 = vpop.f32.mrf.mxu3  ;;  %v2781_v57 = vpop.f32.mrf.mxu1 }
 0x1c4   : > { %v2878_v50 = vadd.f32 %v2877_v12, %v2829_v11  ;;  %v2782_v4 = vadd.f32 %v2781_v57, %v4876_v60 }
 0x1c5   : > { %v2928_v28 = vpop.f32.mrf.mxu0 }
 0x1c6   : > { %v2927_v18 = vadd.f32 %v2926_v13, %v2878_v50 }
 0x1c8   : > { %v2945_v19 = vmax.f32 %v2927_v18, 0.0 }
 0x1c9   : > { %v2830_v63 = vpop.f32.mrf.mxu2 }
 0x1ca   : > { %2961 = vst [vmem:[%s4882_s23 + $0x70] sm:$0xff] %v2945_v19  ;;  %v2831_v29 = vadd.f32 %v2830_v63, %v2782_v4 }
 0x1cb   : > { %v2879_v25 = vpop.f32.mrf.mxu3 }
 0x1cc   : > { %v2880_v26 = vadd.f32 %v2879_v25, %v2831_v29 }
 0x1ce   : > { %v2929_v21 = vadd.f32 %v2928_v28, %v2880_v26 }
 0x1d0   : > { %v2946_v52 = vmax.f32 %v2929_v21, 0.0 }
 0x1d2   : > { %2962 = vst [vmem:[%s4882_s23 + $0x78] sm:$0xff] %v2946_v52 }
 0x1d3 PF: > { %s13_s16 = sadd.s32 1, %s4059_s16   ;;  %s4938_s12 = smov %s4051_s14 }
 0x1d4   : > { %p10_p7 = scmp.ge.s32.totalorder %s13_s16, 6   ;;  %s4939_s13 = smov %s4055_s15 }
 0x1d5   : > { %s4940_s14 = smov %s4943_s17  ;;  %s4941_s15 = smov %s4947_s18 }
 0x1d6   :  { %12 = sbr.rel (!%p10_p7) target bundleno = 3 (0x3), region = 65 }

</bundles_post_ra>
